<compile_context>
chip_gen: v7x
topology: tpu7x:2x2x1
jax: 0.10.0
libtpu: 0.0.40
codegen_flags: <defaults>
</compile_context>

<pallas_src>
import functools
import math

import jax
import jax.numpy as jnp
from jax.experimental import pallas as pl
from jax.experimental.pallas import tpu as pltpu

EPS = 1e-5


# ------------------------------------------------------------- helpers ------

def _mm_t(x, w, dtype):
    """x @ w.T with w in torch (out, in) layout; f32 accumulation on the MXU."""
    return jax.lax.dot_general(x.astype(dtype), w.astype(dtype),
                               (((1,), (1,)), ((), ())),
                               preferred_element_type=jnp.float32)


def _mm(x, w, dtype):
    """x @ w with w already (in, out); f32 accumulation on the MXU."""
    return jax.lax.dot_general(x.astype(dtype), w.astype(dtype),
                               (((1,), (0,)), ((), ())),
                               preferred_element_type=jnp.float32)


def _add_layernorm(x, y, g, b, eps):
    """LayerNorm(x + y) over the last dim (biased variance, like torch LN)."""
    z = x + y
    mu = jnp.mean(z, axis=-1, keepdims=True)
    zc = z - mu
    var = jnp.mean(zc * zc, axis=-1, keepdims=True)
    return zc * jax.lax.rsqrt(var + eps) * g + b


def _mha(x_q, x_kv, w_in_ref, b_in2_ref, w_out_t_ref, b_out_ref, nhead, dtype,
         approx_recip):
    """Multi-head attention for one batch element (no mask, eval mode).

    x_q: (Lq, E) queries, x_kv: (Lk, E) keys/values (f32 values).
    w_in_ref:    (3E, E) packed [Wq; Wk; Wv], torch (out, in) layout.
    b_in2_ref:   (3*nhead, dh) packed in-proj bias, one head per sublane row.
    w_out_t_ref: (E, E) out-proj weight pre-transposed to (in, out).
    b_out_ref:   (1, E) out-proj bias.
    Per-head weight slices are sublane slices (cheap) and head outputs are
    accumulated directly into the out-projection, so no lane-axis slicing of
    activations and no lane concatenation.
    """
    lq, e = x_q.shape
    dh = e // nhead
    scale = 1.0 / math.sqrt(dh)
    y = jnp.zeros((lq, e), jnp.float32)
    for h in range(nhead):                       # static unroll; nhead is small
        r0 = h * dh
        wq = w_in_ref[r0:r0 + dh, :]                     # (dh, E) sublane slice
        wk = w_in_ref[e + r0:e + r0 + dh, :]
        wv = w_in_ref[2 * e + r0:2 * e + r0 + dh, :]
        q = _mm_t(x_q, wq, dtype) + b_in2_ref[h:h + 1, :]            # (Lq, dh)
        k = _mm_t(x_kv, wk, dtype) + b_in2_ref[nhead + h:nhead + h + 1, :]
        v = _mm_t(x_kv, wv, dtype) + b_in2_ref[2 * nhead + h:2 * nhead + h + 1, :]
        s = _mm_t(q, k, dtype) * scale                               # (Lq, Lk)
        m = jnp.max(s, axis=-1, keepdims=True)
        p = jnp.exp(s - m)
        den = jnp.sum(p, axis=-1, keepdims=True)
        if approx_recip:
            p = p * pl.reciprocal(den, approx=True)   # EUP slot, frees the VALU
        else:
            p = p / den                               # exact path for validation
        ctx = _mm(p, v, dtype)                                       # (Lq, dh)
        # Head merge + out-projection fused by linearity (no lane concat):
        y = y + _mm(ctx, w_out_t_ref[r0:r0 + dh, :], dtype)          # (Lq, E)
    return y + b_out_ref[...]


# --------------------------------------------------------------- kernel -----

def _decoder_layer_kernel(
        tgt_ref, mem_ref,
        sa_w_in_ref, sa_b_in_ref, sa_w_out_t_ref, sa_b_out_ref,
        ca_w_in_ref, ca_b_in_ref, ca_w_out_t_ref, ca_b_out_ref,
        ff_w1_ref, ff_b1_ref, ff_w2_ref, ff_b2_ref,
        ln1_g_ref, ln1_b_ref, ln2_g_ref, ln2_b_ref, ln3_g_ref, ln3_b_ref,
        o_ref, *, nhead, eps, compute_dtype, approx_recip):
    i = pl.program_id(0)
    nbatch = tgt_ref.shape[1]

    # Batch element i of the (seq, N, E) inputs.  N is tiny, so pick the batch
    # column with a static unrolled compare+select: this avoids any host-side
    # (L,N,E)<->(N,L,E) transpose (and its HBM round trip) and any dynamic
    # sublane slicing.  TODO(synk): for large N use a batch-major layout /
    # per-batch input blocks instead of this O(N) select.
    x = tgt_ref[:, 0, :]
    mem = mem_ref[:, 0, :]
    for n in range(1, nbatch):
        x = jnp.where(i == n, tgt_ref[:, n, :], x)
        mem = jnp.where(i == n, mem_ref[:, n, :], mem)
    x = x.astype(jnp.float32)                                         # (L, E)
    mem = mem.astype(jnp.float32)                                     # (S, E)

    # 1) self-attention + residual + LayerNorm1 (post-norm).
    sa = _mha(x, x, sa_w_in_ref, sa_b_in_ref, sa_w_out_t_ref, sa_b_out_ref,
              nhead, compute_dtype, approx_recip)
    x = _add_layernorm(x, sa, ln1_g_ref[...], ln1_b_ref[...], eps)

    # 2) cross-attention over memory + residual + LayerNorm2.
    ca = _mha(x, mem, ca_w_in_ref, ca_b_in_ref, ca_w_out_t_ref, ca_b_out_ref,
              nhead, compute_dtype, approx_recip)
    x = _add_layernorm(x, ca, ln2_g_ref[...], ln2_b_ref[...], eps)

    # 3) feed-forward (linear1 -> ReLU -> linear2) + residual + LayerNorm3.
    h = jnp.maximum(_mm_t(x, ff_w1_ref[...], compute_dtype) + ff_b1_ref[...], 0.0)
    y = _mm_t(h, ff_w2_ref[...], compute_dtype) + ff_b2_ref[...]
    x = _add_layernorm(x, y, ln3_g_ref[...], ln3_b_ref[...], eps)

    o_ref[0] = x.astype(o_ref.dtype)


# -------------------------------------------------------------- wrapper -----

def _const_index_map(ndim):
    return lambda i: (0,) * ndim


def _full_spec(arr):
    """Whole-array block with a constant index map (VMEM-resident)."""
    return pl.BlockSpec(arr.shape, _const_index_map(arr.ndim))


def transformer_decoder_layer(tgt, memory, params, nhead, *, eps=EPS,
                              compute_dtype=jnp.float32, approx_recip=True):
    """Post-norm decoder layer: x = LN1(x+SA(x)); x = LN2(x+CA(x,mem)); x = LN3(x+FF(x)).

    tgt: (L, N, E), memory: (S, N, E)   (batch_first=False, like the torch module).
    Returns (L, N, E).
    """
    L, N, E = tgt.shape
    S = memory.shape[0]
    dff = params["ff_w1"].shape[0]
    dh = E // nhead

    # Parameter-only re-layouts (tiny, weight-sized; no activation transposes):
    #  * in-proj biases  -> (3*nhead, dh) so each head's bias is a sublane row
    #  * out-proj weights -> (in, out) so per-head slices are sublane slices
    sa_b_in2 = params["sa_in_b"].reshape(3 * nhead, dh)
    ca_b_in2 = params["ca_in_b"].reshape(3 * nhead, dh)
    sa_w_out_t = params["sa_out_w"].T
    ca_w_out_t = params["ca_out_w"].T
    row = lambda v: v.reshape(1, -1)

    operands = (
        tgt, memory,
        params["sa_in_w"], sa_b_in2, sa_w_out_t, row(params["sa_out_b"]),
        params["ca_in_w"], ca_b_in2, ca_w_out_t, row(params["ca_out_b"]),
        params["ff_w1"], row(params["ff_b1"]),
        params["ff_w2"], row(params["ff_b2"]),
        row(params["ln1_g"]), row(params["ln1_b"]),
        row(params["ln2_g"]), row(params["ln2_b"]),
        row(params["ln3_g"]), row(params["ln3_b"]),
    )

    flops = N * (
        2 * L * E * 3 * E + 2 * L * E * E + 4 * L * L * E        # self-attention
        + 2 * L * E * E + 4 * S * E * E + 4 * L * S * E + 2 * L * E * E  # cross
        + 4 * L * E * dff)                                       # feed-forward
    transcendentals = N * nhead * (L * L + L * S)
    bytes_accessed = 4 * (2 * L * N * E + S * N * E
                          + sum(int(v.size) for v in params.values()))
    cost = pl.CostEstimate(flops=flops, transcendentals=transcendentals,
                           bytes_accessed=bytes_accessed)

    out_nle = pl.pallas_call(
        functools.partial(_decoder_layer_kernel, nhead=nhead, eps=eps,
                          compute_dtype=compute_dtype,
                          approx_recip=approx_recip),
        out_shape=jax.ShapeDtypeStruct((N, L, E), tgt.dtype),
        grid=(N,),
        in_specs=[_full_spec(op) for op in operands],
        out_specs=pl.BlockSpec((1, L, E), lambda i: (i, 0, 0)),
        compiler_params=pltpu.CompilerParams(dimension_semantics=("parallel",)),
        cost_estimate=cost,
    )(*operands)

    # Single tiny relayout back to the module's (L, N, E) convention.  (An
    # (L, 1, E) output block on the middle axis would break the (8,128) block
    # tiling rule and a revisited full-array output would force "arbitrary"
    # semantics, losing the 2-way v7x parallelism.)
    return jnp.transpose(out_nle, (1, 0, 2))


# ------------------------------------------------------------- reference ----

def _reference_forward(tgt, memory, p, nhead, eps=EPS):
    """Pure-JAX fp32 reference matching torch semantics (for validation)."""
    P = jax.lax.Precision.HIGHEST
    L, N, E = tgt.shape
    dh = E // nhead

    def mha(xq, xkv, w_in, b_in, w_out, b_out):
        q = jnp.einsum("lne,oe->lno", xq, w_in[:E], precision=P) + b_in[:E]
        k = jnp.einsum("lne,oe->lno", xkv, w_in[E:2 * E], precision=P) + b_in[E:2 * E]
        v = jnp.einsum("lne,oe->lno", xkv, w_in[2 * E:], precision=P) + b_in[2 * E:]
        q = q.reshape(-1, N, nhead, dh)
        k = k.reshape(-1, N, nhead, dh)
        v = v.reshape(-1, N, nhead, dh)
        s = jnp.einsum("qnhd,knhd->nhqk", q, k, precision=P) / math.sqrt(dh)
        a = jax.nn.softmax(s, axis=-1)
        ctx = jnp.einsum("nhqk,knhd->qnhd", a, v, precision=P).reshape(-1, N, E)
        return jnp.einsum("qne,oe->qno", ctx, w_out, precision=P) + b_out

    def ln(z, g, b):
        mu = z.mean(-1, keepdims=True)
        zc = z - mu
        var = (zc * zc).mean(-1, keepdims=True)
        return zc * jax.lax.rsqrt(var + eps) * g + b

    x = tgt
    x = ln(x + mha(x, x, p["sa_in_w"], p["sa_in_b"], p["sa_out_w"], p["sa_out_b"]),
           p["ln1_g"], p["ln1_b"])
    x = ln(x + mha(x, memory, p["ca_in_w"], p["ca_in_b"], p["ca_out_w"], p["ca_out_b"]),
           p["ln2_g"], p["ln2_b"])
    h = jax.nn.relu(jnp.einsum("lne,fe->lnf", x, p["ff_w1"], precision=P) + p["ff_b1"])
    y = jnp.einsum("lnf,ef->lne", h, p["ff_w2"], precision=P) + p["ff_b2"]
    return ln(x + y, p["ln3_g"], p["ln3_b"])


# --------------------------------------------------------------- params -----

def _xavier(key, shape):
    fan_out, fan_in = shape
    a = math.sqrt(6.0 / (fan_in + fan_out))
    return jax.random.uniform(key, shape, jnp.float32, -a, a)


def init_params(key, d_model, dim_ff):
    # Weights kept in torch (out_features, in_features) layout; biases / LN
    # params made non-trivial so the validation exercises every term.
    ks = jax.random.split(key, 18)
    small = lambda k, n: 0.02 * jax.random.normal(k, (n,), jnp.float32)
    return {
        "sa_in_w": _xavier(ks[0], (3 * d_model, d_model)), "sa_in_b": small(ks[1], 3 * d_model),
        "sa_out_w": _xavier(ks[2], (d_model, d_model)),    "sa_out_b": small(ks[3], d_model),
        "ca_in_w": _xavier(ks[4], (3 * d_model, d_model)), "ca_in_b": small(ks[5], 3 * d_model),
        "ca_out_w": _xavier(ks[6], (d_model, d_model)),    "ca_out_b": small(ks[7], d_model),
        "ff_w1": _xavier(ks[8], (dim_ff, d_model)),        "ff_b1": small(ks[9], dim_ff),
        "ff_w2": _xavier(ks[10], (d_model, dim_ff)),       "ff_b2": small(ks[11], d_model),
        "ln1_g": 1.0 + small(ks[12], d_model), "ln1_b": small(ks[13], d_model),
        "ln2_g": 1.0 + small(ks[14], d_model), "ln2_b": small(ks[15], d_model),
        "ln3_g": 1.0 + small(ks[16], d_model), "ln3_b": small(ks[17], d_model),
    }


# ----------------------------------------------------------------- main -----

if __name__ == "__main__":
    d_model, nhead, dim_ff = 32, 4, 64
    L, S, N = 8, 10, 2          # tgt len, memory len, batch

    key = jax.random.PRNGKey(0)
    k_tgt, k_mem, k_par = jax.random.split(key, 3)
    tgt = jax.random.normal(k_tgt, (L, N, d_model), jnp.float32)
    memory = jax.random.normal(k_mem, (S, N, d_model), jnp.float32)
    params = init_params(k_par, d_model, dim_ff)

    fwd = jax.jit(functools.partial(transformer_decoder_layer, nhead=nhead))
    out = fwd(tgt, memory, params)
    jax.block_until_ready(out)

    assert out.shape == (L, N, d_model) and out.dtype == jnp.float32
    ref = _reference_forward(tgt, memory, params, nhead)
    # Loose tolerance: covers the approximate EUP reciprocal in the softmax and
    # bf16-pass MXU rounding, while still catching any structural error.
    assert bool(jnp.allclose(out, ref, atol=5e-2, rtol=5e-2))
    print("KERNEL_OK")
</pallas_src>

<mosaic_0001>
module attributes {stable_mosaic.version = 11 : i64} {
  func.func @_decoder_layer_kernel(%arg0: i32, %arg1: memref<8x2x32xf32, #tpu.memory_space<vmem>>, %arg2: memref<10x2x32xf32, #tpu.memory_space<vmem>>, %arg3: memref<96x32xf32, #tpu.memory_space<vmem>>, %arg4: memref<12x8xf32, #tpu.memory_space<vmem>>, %arg5: memref<32x32xf32, #tpu.memory_space<vmem>>, %arg6: memref<1x32xf32, #tpu.memory_space<vmem>>, %arg7: memref<96x32xf32, #tpu.memory_space<vmem>>, %arg8: memref<12x8xf32, #tpu.memory_space<vmem>>, %arg9: memref<32x32xf32, #tpu.memory_space<vmem>>, %arg10: memref<1x32xf32, #tpu.memory_space<vmem>>, %arg11: memref<64x32xf32, #tpu.memory_space<vmem>>, %arg12: memref<1x64xf32, #tpu.memory_space<vmem>>, %arg13: memref<32x64xf32, #tpu.memory_space<vmem>>, %arg14: memref<1x32xf32, #tpu.memory_space<vmem>>, %arg15: memref<1x32xf32, #tpu.memory_space<vmem>>, %arg16: memref<1x32xf32, #tpu.memory_space<vmem>>, %arg17: memref<1x32xf32, #tpu.memory_space<vmem>>, %arg18: memref<1x32xf32, #tpu.memory_space<vmem>>, %arg19: memref<1x32xf32, #tpu.memory_space<vmem>>, %arg20: memref<1x32xf32, #tpu.memory_space<vmem>>, %arg21: memref<1x8x32xf32, #tpu.memory_space<vmem>>) attributes {dimension_semantics = [#tpu.dimension_semantics<parallel>], iteration_bounds = array<i64: 2>, scalar_prefetch = 0 : i64, scratch_operands = 0 : i64, tpu.core_type = #tpu.core_type<tc>, window_params = [{pipeline_mode = #tpu.pipeline_mode<synchronous>, transform_indices = @transform_0, window_bounds = array<i64: 8, 2, 32>}, {pipeline_mode = #tpu.pipeline_mode<synchronous>, transform_indices = @transform_1, window_bounds = array<i64: 10, 2, 32>}, {pipeline_mode = #tpu.pipeline_mode<synchronous>, transform_indices = @transform_2, window_bounds = array<i64: 96, 32>}, {pipeline_mode = #tpu.pipeline_mode<synchronous>, transform_indices = @transform_3, window_bounds = array<i64: 12, 8>}, {pipeline_mode = #tpu.pipeline_mode<synchronous>, transform_indices = @transform_4, window_bounds = array<i64: 32, 32>}, {pipeline_mode = #tpu.pipeline_mode<synchronous>, transform_indices = @transform_5, window_bounds = array<i64: 1, 32>}, {pipeline_mode = #tpu.pipeline_mode<synchronous>, transform_indices = @transform_6, window_bounds = array<i64: 96, 32>}, {pipeline_mode = #tpu.pipeline_mode<synchronous>, transform_indices = @transform_7, window_bounds = array<i64: 12, 8>}, {pipeline_mode = #tpu.pipeline_mode<synchronous>, transform_indices = @transform_8, window_bounds = array<i64: 32, 32>}, {pipeline_mode = #tpu.pipeline_mode<synchronous>, transform_indices = @transform_9, window_bounds = array<i64: 1, 32>}, {pipeline_mode = #tpu.pipeline_mode<synchronous>, transform_indices = @transform_10, window_bounds = array<i64: 64, 32>}, {pipeline_mode = #tpu.pipeline_mode<synchronous>, transform_indices = @transform_11, window_bounds = array<i64: 1, 64>}, {pipeline_mode = #tpu.pipeline_mode<synchronous>, transform_indices = @transform_12, window_bounds = array<i64: 32, 64>}, {pipeline_mode = #tpu.pipeline_mode<synchronous>, transform_indices = @transform_13, window_bounds = array<i64: 1, 32>}, {pipeline_mode = #tpu.pipeline_mode<synchronous>, transform_indices = @transform_14, window_bounds = array<i64: 1, 32>}, {pipeline_mode = #tpu.pipeline_mode<synchronous>, transform_indices = @transform_15, window_bounds = array<i64: 1, 32>}, {pipeline_mode = #tpu.pipeline_mode<synchronous>, transform_indices = @transform_16, window_bounds = array<i64: 1, 32>}, {pipeline_mode = #tpu.pipeline_mode<synchronous>, transform_indices = @transform_17, window_bounds = array<i64: 1, 32>}, {pipeline_mode = #tpu.pipeline_mode<synchronous>, transform_indices = @transform_18, window_bounds = array<i64: 1, 32>}, {pipeline_mode = #tpu.pipeline_mode<synchronous>, transform_indices = @transform_19, window_bounds = array<i64: 1, 32>}, {transform_indices = @transform_20, window_bounds = array<i64: 1, 8, 32>}]} {
    %c0 = arith.constant 0 : index
    %c0_0 = arith.constant 0 : index
    %c0_1 = arith.constant 0 : index
    %0 = vector.load %arg1[%c0, %c0_0, %c0_1] : memref<8x2x32xf32, #tpu.memory_space<vmem>>, vector<8x1x32xf32>
    %1 = vector.shape_cast %0 : vector<8x1x32xf32> to vector<8x32xf32>
    %c0_2 = arith.constant 0 : index
    %c0_3 = arith.constant 0 : index
    %c0_4 = arith.constant 0 : index
    %2 = vector.load %arg2[%c0_2, %c0_3, %c0_4] : memref<10x2x32xf32, #tpu.memory_space<vmem>>, vector<10x1x32xf32>
    %3 = vector.shape_cast %2 : vector<10x1x32xf32> to vector<10x32xf32>
    %c1_i32 = arith.constant 1 : i32
    %4 = arith.cmpi eq, %arg0, %c1_i32 : i32
    %c0_5 = arith.constant 0 : index
    %c1 = arith.constant 1 : index
    %c0_6 = arith.constant 0 : index
    %5 = vector.load %arg1[%c0_5, %c1, %c0_6] : memref<8x2x32xf32, #tpu.memory_space<vmem>>, vector<8x1x32xf32>
    %6 = vector.shape_cast %5 : vector<8x1x32xf32> to vector<8x32xf32>
    %7 = arith.select %4, %6, %1 : vector<8x32xf32>
    %c1_i32_7 = arith.constant 1 : i32
    %8 = arith.cmpi eq, %arg0, %c1_i32_7 : i32
    %c0_8 = arith.constant 0 : index
    %c1_9 = arith.constant 1 : index
    %c0_10 = arith.constant 0 : index
    %9 = vector.load %arg2[%c0_8, %c1_9, %c0_10] : memref<10x2x32xf32, #tpu.memory_space<vmem>>, vector<10x1x32xf32>
    %10 = vector.shape_cast %9 : vector<10x1x32xf32> to vector<10x32xf32>
    %11 = arith.select %8, %10, %3 : vector<10x32xf32>
    %cst = arith.constant 0.000000e+00 : f32
    %12 = vector.broadcast %cst : f32 to vector<8x32xf32>
    %c0_11 = arith.constant 0 : index
    %c0_12 = arith.constant 0 : index
    %13 = vector.load %arg3[%c0_11, %c0_12] : memref<96x32xf32, #tpu.memory_space<vmem>>, vector<8x32xf32>
    %c32 = arith.constant 32 : index
    %c0_13 = arith.constant 0 : index
    %14 = vector.load %arg3[%c32, %c0_13] : memref<96x32xf32, #tpu.memory_space<vmem>>, vector<8x32xf32>
    %c64 = arith.constant 64 : index
    %c0_14 = arith.constant 0 : index
    %15 = vector.load %arg3[%c64, %c0_14] : memref<96x32xf32, #tpu.memory_space<vmem>>, vector<8x32xf32>
    %cst_15 = arith.constant dense<0.000000e+00> : vector<8x8xf32>
    %16 = tpu.matmul %7, %13, %cst_15 {dimension_numbers = #tpu.dot_dimension_numbers<[1], [1], [0], [0], [0, 0, 1, 0], [], []>} : vector<8x32xf32>, vector<8x32xf32>, vector<8x8xf32> -> vector<8x8xf32>
    %c0_16 = arith.constant 0 : index
    %c0_17 = arith.constant 0 : index
    %17 = vector.load %arg4[%c0_16, %c0_17] : memref<12x8xf32, #tpu.memory_space<vmem>>, vector<1x8xf32>
    %18 = vector.broadcast %17 : vector<1x8xf32> to vector<8x8xf32>
    %19 = arith.addf %16, %18 : vector<8x8xf32>
    %cst_18 = arith.constant dense<0.000000e+00> : vector<8x8xf32>
    %20 = tpu.matmul %7, %14, %cst_18 {dimension_numbers = #tpu.dot_dimension_numbers<[1], [1], [0], [0], [0, 0, 1, 0], [], []>} : vector<8x32xf32>, vector<8x32xf32>, vector<8x8xf32> -> vector<8x8xf32>
    %c4 = arith.constant 4 : index
    %c0_19 = arith.constant 0 : index
    %21 = vector.load %arg4[%c4, %c0_19] : memref<12x8xf32, #tpu.memory_space<vmem>>, vector<1x8xf32>
    %22 = vector.broadcast %21 : vector<1x8xf32> to vector<8x8xf32>
    %23 = arith.addf %20, %22 : vector<8x8xf32>
    %cst_20 = arith.constant dense<0.000000e+00> : vector<8x8xf32>
    %24 = tpu.matmul %7, %15, %cst_20 {dimension_numbers = #tpu.dot_dimension_numbers<[1], [1], [0], [0], [0, 0, 1, 0], [], []>} : vector<8x32xf32>, vector<8x32xf32>, vector<8x8xf32> -> vector<8x8xf32>
    %c8 = arith.constant 8 : index
    %c0_21 = arith.constant 0 : index
    %25 = vector.load %arg4[%c8, %c0_21] : memref<12x8xf32, #tpu.memory_space<vmem>>, vector<1x8xf32>
    %26 = vector.broadcast %25 : vector<1x8xf32> to vector<8x8xf32>
    %27 = arith.addf %24, %26 : vector<8x8xf32>
    %cst_22 = arith.constant dense<0.000000e+00> : vector<8x8xf32>
    %28 = tpu.matmul %19, %23, %cst_22 {dimension_numbers = #tpu.dot_dimension_numbers<[1], [1], [0], [0], [0, 0, 1, 0], [], []>} : vector<8x8xf32>, vector<8x8xf32>, vector<8x8xf32> -> vector<8x8xf32>
    %cst_23 = arith.constant 0.353553385 : f32
    %29 = vector.broadcast %cst_23 : f32 to vector<8x8xf32>
    %30 = arith.mulf %28, %29 : vector<8x8xf32>
    %cst_24 = arith.constant dense<0xFF800000> : vector<8xf32>
    %31 = vector.multi_reduction <maximumf>, %30, %cst_24 [1] : vector<8x8xf32> to vector<8xf32>
    %32 = vector.shape_cast %31 : vector<8xf32> to vector<8x1xf32>
    %33 = vector.broadcast %32 : vector<8x1xf32> to vector<8x8xf32>
    %34 = arith.subf %30, %33 : vector<8x8xf32>
    %35 = math.exp %34 : vector<8x8xf32>
    %cst_25 = arith.constant dense<0.000000e+00> : vector<8xf32>
    %36 = vector.multi_reduction <add>, %35, %cst_25 [1] : vector<8x8xf32> to vector<8xf32>
    %37 = vector.shape_cast %36 : vector<8xf32> to vector<8x1xf32>
    %38 = tpu.reciprocal %37 {approx = true} : vector<8x1xf32> -> vector<8x1xf32>
    %39 = vector.broadcast %38 : vector<8x1xf32> to vector<8x8xf32>
    %40 = arith.mulf %35, %39 : vector<8x8xf32>
    %cst_26 = arith.constant dense<0.000000e+00> : vector<8x8xf32>
    %41 = tpu.matmul %40, %27, %cst_26 {dimension_numbers = #tpu.dot_dimension_numbers<[1], [0], [0], [1], [0, 0, 1, 1], [], []>} : vector<8x8xf32>, vector<8x8xf32>, vector<8x8xf32> -> vector<8x8xf32>
    %c0_27 = arith.constant 0 : index
    %c0_28 = arith.constant 0 : index
    %42 = vector.load %arg5[%c0_27, %c0_28] : memref<32x32xf32, #tpu.memory_space<vmem>>, vector<8x32xf32>
    %cst_29 = arith.constant dense<0.000000e+00> : vector<8x32xf32>
    %43 = tpu.matmul %41, %42, %cst_29 {dimension_numbers = #tpu.dot_dimension_numbers<[1], [0], [0], [1], [0, 0, 1, 1], [], []>} : vector<8x8xf32>, vector<8x32xf32>, vector<8x32xf32> -> vector<8x32xf32>
    %44 = arith.addf %12, %43 : vector<8x32xf32>
    %c8_30 = arith.constant 8 : index
    %c0_31 = arith.constant 0 : index
    %45 = vector.load %arg3[%c8_30, %c0_31] : memref<96x32xf32, #tpu.memory_space<vmem>>, vector<8x32xf32>
    %c40 = arith.constant 40 : index
    %c0_32 = arith.constant 0 : index
    %46 = vector.load %arg3[%c40, %c0_32] : memref<96x32xf32, #tpu.memory_space<vmem>>, vector<8x32xf32>
    %c72 = arith.constant 72 : index
    %c0_33 = arith.constant 0 : index
    %47 = vector.load %arg3[%c72, %c0_33] : memref<96x32xf32, #tpu.memory_space<vmem>>, vector<8x32xf32>
    %cst_34 = arith.constant dense<0.000000e+00> : vector<8x8xf32>
    %48 = tpu.matmul %7, %45, %cst_34 {dimension_numbers = #tpu.dot_dimension_numbers<[1], [1], [0], [0], [0, 0, 1, 0], [], []>} : vector<8x32xf32>, vector<8x32xf32>, vector<8x8xf32> -> vector<8x8xf32>
    %c1_35 = arith.constant 1 : index
    %c0_36 = arith.constant 0 : index
    %49 = vector.load %arg4[%c1_35, %c0_36] : memref<12x8xf32, #tpu.memory_space<vmem>>, vector<1x8xf32>
    %50 = vector.broadcast %49 : vector<1x8xf32> to vector<8x8xf32>
    %51 = arith.addf %48, %50 : vector<8x8xf32>
    %cst_37 = arith.constant dense<0.000000e+00> : vector<8x8xf32>
    %52 = tpu.matmul %7, %46, %cst_37 {dimension_numbers = #tpu.dot_dimension_numbers<[1], [1], [0], [0], [0, 0, 1, 0], [], []>} : vector<8x32xf32>, vector<8x32xf32>, vector<8x8xf32> -> vector<8x8xf32>
    %c5 = arith.constant 5 : index
    %c0_38 = arith.constant 0 : index
    %53 = vector.load %arg4[%c5, %c0_38] : memref<12x8xf32, #tpu.memory_space<vmem>>, vector<1x8xf32>
    %54 = vector.broadcast %53 : vector<1x8xf32> to vector<8x8xf32>
    %55 = arith.addf %52, %54 : vector<8x8xf32>
    %cst_39 = arith.constant dense<0.000000e+00> : vector<8x8xf32>
    %56 = tpu.matmul %7, %47, %cst_39 {dimension_numbers = #tpu.dot_dimension_numbers<[1], [1], [0], [0], [0, 0, 1, 0], [], []>} : vector<8x32xf32>, vector<8x32xf32>, vector<8x8xf32> -> vector<8x8xf32>
    %c9 = arith.constant 9 : index
    %c0_40 = arith.constant 0 : index
    %57 = vector.load %arg4[%c9, %c0_40] : memref<12x8xf32, #tpu.memory_space<vmem>>, vector<1x8xf32>
    %58 = vector.broadcast %57 : vector<1x8xf32> to vector<8x8xf32>
    %59 = arith.addf %56, %58 : vector<8x8xf32>
    %cst_41 = arith.constant dense<0.000000e+00> : vector<8x8xf32>
    %60 = tpu.matmul %51, %55, %cst_41 {dimension_numbers = #tpu.dot_dimension_numbers<[1], [1], [0], [0], [0, 0, 1, 0], [], []>} : vector<8x8xf32>, vector<8x8xf32>, vector<8x8xf32> -> vector<8x8xf32>
    %cst_42 = arith.constant 0.353553385 : f32
    %61 = vector.broadcast %cst_42 : f32 to vector<8x8xf32>
    %62 = arith.mulf %60, %61 : vector<8x8xf32>
    %cst_43 = arith.constant dense<0xFF800000> : vector<8xf32>
    %63 = vector.multi_reduction <maximumf>, %62, %cst_43 [1] : vector<8x8xf32> to vector<8xf32>
    %64 = vector.shape_cast %63 : vector<8xf32> to vector<8x1xf32>
    %65 = vector.broadcast %64 : vector<8x1xf32> to vector<8x8xf32>
    %66 = arith.subf %62, %65 : vector<8x8xf32>
    %67 = math.exp %66 : vector<8x8xf32>
    %cst_44 = arith.constant dense<0.000000e+00> : vector<8xf32>
    %68 = vector.multi_reduction <add>, %67, %cst_44 [1] : vector<8x8xf32> to vector<8xf32>
    %69 = vector.shape_cast %68 : vector<8xf32> to vector<8x1xf32>
    %70 = tpu.reciprocal %69 {approx = true} : vector<8x1xf32> -> vector<8x1xf32>
    %71 = vector.broadcast %70 : vector<8x1xf32> to vector<8x8xf32>
    %72 = arith.mulf %67, %71 : vector<8x8xf32>
    %cst_45 = arith.constant dense<0.000000e+00> : vector<8x8xf32>
    %73 = tpu.matmul %72, %59, %cst_45 {dimension_numbers = #tpu.dot_dimension_numbers<[1], [0], [0], [1], [0, 0, 1, 1], [], []>} : vector<8x8xf32>, vector<8x8xf32>, vector<8x8xf32> -> vector<8x8xf32>
    %c8_46 = arith.constant 8 : index
    %c0_47 = arith.constant 0 : index
    %74 = vector.load %arg5[%c8_46, %c0_47] : memref<32x32xf32, #tpu.memory_space<vmem>>, vector<8x32xf32>
    %cst_48 = arith.constant dense<0.000000e+00> : vector<8x32xf32>
    %75 = tpu.matmul %73, %74, %cst_48 {dimension_numbers = #tpu.dot_dimension_numbers<[1], [0], [0], [1], [0, 0, 1, 1], [], []>} : vector<8x8xf32>, vector<8x32xf32>, vector<8x32xf32> -> vector<8x32xf32>
    %76 = arith.addf %44, %75 : vector<8x32xf32>
    %c16 = arith.constant 16 : index
    %c0_49 = arith.constant 0 : index
    %77 = vector.load %arg3[%c16, %c0_49] : memref<96x32xf32, #tpu.memory_space<vmem>>, vector<8x32xf32>
    %c48 = arith.constant 48 : index
    %c0_50 = arith.constant 0 : index
    %78 = vector.load %arg3[%c48, %c0_50] : memref<96x32xf32, #tpu.memory_space<vmem>>, vector<8x32xf32>
    %c80 = arith.constant 80 : index
    %c0_51 = arith.constant 0 : index
    %79 = vector.load %arg3[%c80, %c0_51] : memref<96x32xf32, #tpu.memory_space<vmem>>, vector<8x32xf32>
    %cst_52 = arith.constant dense<0.000000e+00> : vector<8x8xf32>
    %80 = tpu.matmul %7, %77, %cst_52 {dimension_numbers = #tpu.dot_dimension_numbers<[1], [1], [0], [0], [0, 0, 1, 0], [], []>} : vector<8x32xf32>, vector<8x32xf32>, vector<8x8xf32> -> vector<8x8xf32>
    %c2 = arith.constant 2 : index
    %c0_53 = arith.constant 0 : index
    %81 = vector.load %arg4[%c2, %c0_53] : memref<12x8xf32, #tpu.memory_space<vmem>>, vector<1x8xf32>
    %82 = vector.broadcast %81 : vector<1x8xf32> to vector<8x8xf32>
    %83 = arith.addf %80, %82 : vector<8x8xf32>
    %cst_54 = arith.constant dense<0.000000e+00> : vector<8x8xf32>
    %84 = tpu.matmul %7, %78, %cst_54 {dimension_numbers = #tpu.dot_dimension_numbers<[1], [1], [0], [0], [0, 0, 1, 0], [], []>} : vector<8x32xf32>, vector<8x32xf32>, vector<8x8xf32> -> vector<8x8xf32>
    %c6 = arith.constant 6 : index
    %c0_55 = arith.constant 0 : index
    %85 = vector.load %arg4[%c6, %c0_55] : memref<12x8xf32, #tpu.memory_space<vmem>>, vector<1x8xf32>
    %86 = vector.broadcast %85 : vector<1x8xf32> to vector<8x8xf32>
    %87 = arith.addf %84, %86 : vector<8x8xf32>
    %cst_56 = arith.constant dense<0.000000e+00> : vector<8x8xf32>
    %88 = tpu.matmul %7, %79, %cst_56 {dimension_numbers = #tpu.dot_dimension_numbers<[1], [1], [0], [0], [0, 0, 1, 0], [], []>} : vector<8x32xf32>, vector<8x32xf32>, vector<8x8xf32> -> vector<8x8xf32>
    %c10 = arith.constant 10 : index
    %c0_57 = arith.constant 0 : index
    %89 = vector.load %arg4[%c10, %c0_57] : memref<12x8xf32, #tpu.memory_space<vmem>>, vector<1x8xf32>
    %90 = vector.broadcast %89 : vector<1x8xf32> to vector<8x8xf32>
    %91 = arith.addf %88, %90 : vector<8x8xf32>
    %cst_58 = arith.constant dense<0.000000e+00> : vector<8x8xf32>
    %92 = tpu.matmul %83, %87, %cst_58 {dimension_numbers = #tpu.dot_dimension_numbers<[1], [1], [0], [0], [0, 0, 1, 0], [], []>} : vector<8x8xf32>, vector<8x8xf32>, vector<8x8xf32> -> vector<8x8xf32>
    %cst_59 = arith.constant 0.353553385 : f32
    %93 = vector.broadcast %cst_59 : f32 to vector<8x8xf32>
    %94 = arith.mulf %92, %93 : vector<8x8xf32>
    %cst_60 = arith.constant dense<0xFF800000> : vector<8xf32>
    %95 = vector.multi_reduction <maximumf>, %94, %cst_60 [1] : vector<8x8xf32> to vector<8xf32>
    %96 = vector.shape_cast %95 : vector<8xf32> to vector<8x1xf32>
    %97 = vector.broadcast %96 : vector<8x1xf32> to vector<8x8xf32>
    %98 = arith.subf %94, %97 : vector<8x8xf32>
    %99 = math.exp %98 : vector<8x8xf32>
    %cst_61 = arith.constant dense<0.000000e+00> : vector<8xf32>
    %100 = vector.multi_reduction <add>, %99, %cst_61 [1] : vector<8x8xf32> to vector<8xf32>
    %101 = vector.shape_cast %100 : vector<8xf32> to vector<8x1xf32>
    %102 = tpu.reciprocal %101 {approx = true} : vector<8x1xf32> -> vector<8x1xf32>
    %103 = vector.broadcast %102 : vector<8x1xf32> to vector<8x8xf32>
    %104 = arith.mulf %99, %103 : vector<8x8xf32>
    %cst_62 = arith.constant dense<0.000000e+00> : vector<8x8xf32>
    %105 = tpu.matmul %104, %91, %cst_62 {dimension_numbers = #tpu.dot_dimension_numbers<[1], [0], [0], [1], [0, 0, 1, 1], [], []>} : vector<8x8xf32>, vector<8x8xf32>, vector<8x8xf32> -> vector<8x8xf32>
    %c16_63 = arith.constant 16 : index
    %c0_64 = arith.constant 0 : index
    %106 = vector.load %arg5[%c16_63, %c0_64] : memref<32x32xf32, #tpu.memory_space<vmem>>, vector<8x32xf32>
    %cst_65 = arith.constant dense<0.000000e+00> : vector<8x32xf32>
    %107 = tpu.matmul %105, %106, %cst_65 {dimension_numbers = #tpu.dot_dimension_numbers<[1], [0], [0], [1], [0, 0, 1, 1], [], []>} : vector<8x8xf32>, vector<8x32xf32>, vector<8x32xf32> -> vector<8x32xf32>
    %108 = arith.addf %76, %107 : vector<8x32xf32>
    %c24 = arith.constant 24 : index
    %c0_66 = arith.constant 0 : index
    %109 = vector.load %arg3[%c24, %c0_66] : memref<96x32xf32, #tpu.memory_space<vmem>>, vector<8x32xf32>
    %c56 = arith.constant 56 : index
    %c0_67 = arith.constant 0 : index
    %110 = vector.load %arg3[%c56, %c0_67] : memref<96x32xf32, #tpu.memory_space<vmem>>, vector<8x32xf32>
    %c88 = arith.constant 88 : index
    %c0_68 = arith.constant 0 : index
    %111 = vector.load %arg3[%c88, %c0_68] : memref<96x32xf32, #tpu.memory_space<vmem>>, vector<8x32xf32>
    %cst_69 = arith.constant dense<0.000000e+00> : vector<8x8xf32>
    %112 = tpu.matmul %7, %109, %cst_69 {dimension_numbers = #tpu.dot_dimension_numbers<[1], [1], [0], [0], [0, 0, 1, 0], [], []>} : vector<8x32xf32>, vector<8x32xf32>, vector<8x8xf32> -> vector<8x8xf32>
    %c3 = arith.constant 3 : index
    %c0_70 = arith.constant 0 : index
    %113 = vector.load %arg4[%c3, %c0_70] : memref<12x8xf32, #tpu.memory_space<vmem>>, vector<1x8xf32>
    %114 = vector.broadcast %113 : vector<1x8xf32> to vector<8x8xf32>
    %115 = arith.addf %112, %114 : vector<8x8xf32>
    %cst_71 = arith.constant dense<0.000000e+00> : vector<8x8xf32>
    %116 = tpu.matmul %7, %110, %cst_71 {dimension_numbers = #tpu.dot_dimension_numbers<[1], [1], [0], [0], [0, 0, 1, 0], [], []>} : vector<8x32xf32>, vector<8x32xf32>, vector<8x8xf32> -> vector<8x8xf32>
    %c7 = arith.constant 7 : index
    %c0_72 = arith.constant 0 : index
    %117 = vector.load %arg4[%c7, %c0_72] : memref<12x8xf32, #tpu.memory_space<vmem>>, vector<1x8xf32>
    %118 = vector.broadcast %117 : vector<1x8xf32> to vector<8x8xf32>
    %119 = arith.addf %116, %118 : vector<8x8xf32>
    %cst_73 = arith.constant dense<0.000000e+00> : vector<8x8xf32>
    %120 = tpu.matmul %7, %111, %cst_73 {dimension_numbers = #tpu.dot_dimension_numbers<[1], [1], [0], [0], [0, 0, 1, 0], [], []>} : vector<8x32xf32>, vector<8x32xf32>, vector<8x8xf32> -> vector<8x8xf32>
    %c11 = arith.constant 11 : index
    %c0_74 = arith.constant 0 : index
    %121 = vector.load %arg4[%c11, %c0_74] : memref<12x8xf32, #tpu.memory_space<vmem>>, vector<1x8xf32>
    %122 = vector.broadcast %121 : vector<1x8xf32> to vector<8x8xf32>
    %123 = arith.addf %120, %122 : vector<8x8xf32>
    %cst_75 = arith.constant dense<0.000000e+00> : vector<8x8xf32>
    %124 = tpu.matmul %115, %119, %cst_75 {dimension_numbers = #tpu.dot_dimension_numbers<[1], [1], [0], [0], [0, 0, 1, 0], [], []>} : vector<8x8xf32>, vector<8x8xf32>, vector<8x8xf32> -> vector<8x8xf32>
    %cst_76 = arith.constant 0.353553385 : f32
    %125 = vector.broadcast %cst_76 : f32 to vector<8x8xf32>
    %126 = arith.mulf %124, %125 : vector<8x8xf32>
    %cst_77 = arith.constant dense<0xFF800000> : vector<8xf32>
    %127 = vector.multi_reduction <maximumf>, %126, %cst_77 [1] : vector<8x8xf32> to vector<8xf32>
    %128 = vector.shape_cast %127 : vector<8xf32> to vector<8x1xf32>
    %129 = vector.broadcast %128 : vector<8x1xf32> to vector<8x8xf32>
    %130 = arith.subf %126, %129 : vector<8x8xf32>
    %131 = math.exp %130 : vector<8x8xf32>
    %cst_78 = arith.constant dense<0.000000e+00> : vector<8xf32>
    %132 = vector.multi_reduction <add>, %131, %cst_78 [1] : vector<8x8xf32> to vector<8xf32>
    %133 = vector.shape_cast %132 : vector<8xf32> to vector<8x1xf32>
    %134 = tpu.reciprocal %133 {approx = true} : vector<8x1xf32> -> vector<8x1xf32>
    %135 = vector.broadcast %134 : vector<8x1xf32> to vector<8x8xf32>
    %136 = arith.mulf %131, %135 : vector<8x8xf32>
    %cst_79 = arith.constant dense<0.000000e+00> : vector<8x8xf32>
    %137 = tpu.matmul %136, %123, %cst_79 {dimension_numbers = #tpu.dot_dimension_numbers<[1], [0], [0], [1], [0, 0, 1, 1], [], []>} : vector<8x8xf32>, vector<8x8xf32>, vector<8x8xf32> -> vector<8x8xf32>
    %c24_80 = arith.constant 24 : index
    %c0_81 = arith.constant 0 : index
    %138 = vector.load %arg5[%c24_80, %c0_81] : memref<32x32xf32, #tpu.memory_space<vmem>>, vector<8x32xf32>
    %cst_82 = arith.constant dense<0.000000e+00> : vector<8x32xf32>
    %139 = tpu.matmul %137, %138, %cst_82 {dimension_numbers = #tpu.dot_dimension_numbers<[1], [0], [0], [1], [0, 0, 1, 1], [], []>} : vector<8x8xf32>, vector<8x32xf32>, vector<8x32xf32> -> vector<8x32xf32>
    %140 = arith.addf %108, %139 : vector<8x32xf32>
    %c0_83 = arith.constant 0 : index
    %c0_84 = arith.constant 0 : index
    %141 = vector.load %arg6[%c0_83, %c0_84] : memref<1x32xf32, #tpu.memory_space<vmem>>, vector<1x32xf32>
    %142 = vector.broadcast %141 : vector<1x32xf32> to vector<8x32xf32>
    %143 = arith.addf %140, %142 : vector<8x32xf32>
    %c0_85 = arith.constant 0 : index
    %c0_86 = arith.constant 0 : index
    %144 = vector.load %arg15[%c0_85, %c0_86] : memref<1x32xf32, #tpu.memory_space<vmem>>, vector<1x32xf32>
    %c0_87 = arith.constant 0 : index
    %c0_88 = arith.constant 0 : index
    %145 = vector.load %arg16[%c0_87, %c0_88] : memref<1x32xf32, #tpu.memory_space<vmem>>, vector<1x32xf32>
    %146 = arith.addf %7, %143 : vector<8x32xf32>
    %cst_89 = arith.constant dense<0.000000e+00> : vector<8xf32>
    %147 = vector.multi_reduction <add>, %146, %cst_89 [1] : vector<8x32xf32> to vector<8xf32>
    %148 = vector.shape_cast %147 : vector<8xf32> to vector<8x1xf32>
    %cst_90 = arith.constant 3.200000e+01 : f32
    %149 = vector.broadcast %cst_90 : f32 to vector<8x1xf32>
    %150 = arith.divf %148, %149 : vector<8x1xf32>
    %151 = vector.broadcast %150 : vector<8x1xf32> to vector<8x32xf32>
    %152 = arith.subf %146, %151 : vector<8x32xf32>
    %153 = arith.mulf %152, %152 : vector<8x32xf32>
    %cst_91 = arith.constant dense<0.000000e+00> : vector<8xf32>
    %154 = vector.multi_reduction <add>, %153, %cst_91 [1] : vector<8x32xf32> to vector<8xf32>
    %155 = vector.shape_cast %154 : vector<8xf32> to vector<8x1xf32>
    %cst_92 = arith.constant 3.200000e+01 : f32
    %156 = vector.broadcast %cst_92 : f32 to vector<8x1xf32>
    %157 = arith.divf %155, %156 : vector<8x1xf32>
    %cst_93 = arith.constant 9.99999974E-6 : f32
    %158 = vector.broadcast %cst_93 : f32 to vector<8x1xf32>
    %159 = arith.addf %157, %158 : vector<8x1xf32>
    %160 = math.rsqrt %159 : vector<8x1xf32>
    %161 = vector.broadcast %160 : vector<8x1xf32> to vector<8x32xf32>
    %162 = arith.mulf %152, %161 : vector<8x32xf32>
    %163 = vector.broadcast %144 : vector<1x32xf32> to vector<8x32xf32>
    %164 = arith.mulf %162, %163 : vector<8x32xf32>
    %165 = vector.broadcast %145 : vector<1x32xf32> to vector<8x32xf32>
    %166 = arith.addf %164, %165 : vector<8x32xf32>
    %cst_94 = arith.constant 0.000000e+00 : f32
    %167 = vector.broadcast %cst_94 : f32 to vector<8x32xf32>
    %c0_95 = arith.constant 0 : index
    %c0_96 = arith.constant 0 : index
    %168 = vector.load %arg7[%c0_95, %c0_96] : memref<96x32xf32, #tpu.memory_space<vmem>>, vector<8x32xf32>
    %c32_97 = arith.constant 32 : index
    %c0_98 = arith.constant 0 : index
    %169 = vector.load %arg7[%c32_97, %c0_98] : memref<96x32xf32, #tpu.memory_space<vmem>>, vector<8x32xf32>
    %c64_99 = arith.constant 64 : index
    %c0_100 = arith.constant 0 : index
    %170 = vector.load %arg7[%c64_99, %c0_100] : memref<96x32xf32, #tpu.memory_space<vmem>>, vector<8x32xf32>
    %cst_101 = arith.constant dense<0.000000e+00> : vector<8x8xf32>
    %171 = tpu.matmul %166, %168, %cst_101 {dimension_numbers = #tpu.dot_dimension_numbers<[1], [1], [0], [0], [0, 0, 1, 0], [], []>} : vector<8x32xf32>, vector<8x32xf32>, vector<8x8xf32> -> vector<8x8xf32>
    %c0_102 = arith.constant 0 : index
    %c0_103 = arith.constant 0 : index
    %172 = vector.load %arg8[%c0_102, %c0_103] : memref<12x8xf32, #tpu.memory_space<vmem>>, vector<1x8xf32>
    %173 = vector.broadcast %172 : vector<1x8xf32> to vector<8x8xf32>
    %174 = arith.addf %171, %173 : vector<8x8xf32>
    %cst_104 = arith.constant dense<0.000000e+00> : vector<10x8xf32>
    %175 = tpu.matmul %11, %169, %cst_104 {dimension_numbers = #tpu.dot_dimension_numbers<[1], [1], [0], [0], [0, 0, 1, 0], [], []>} : vector<10x32xf32>, vector<8x32xf32>, vector<10x8xf32> -> vector<10x8xf32>
    %c4_105 = arith.constant 4 : index
    %c0_106 = arith.constant 0 : index
    %176 = vector.load %arg8[%c4_105, %c0_106] : memref<12x8xf32, #tpu.memory_space<vmem>>, vector<1x8xf32>
    %177 = vector.broadcast %176 : vector<1x8xf32> to vector<10x8xf32>
    %178 = arith.addf %175, %177 : vector<10x8xf32>
    %cst_107 = arith.constant dense<0.000000e+00> : vector<10x8xf32>
    %179 = tpu.matmul %11, %170, %cst_107 {dimension_numbers = #tpu.dot_dimension_numbers<[1], [1], [0], [0], [0, 0, 1, 0], [], []>} : vector<10x32xf32>, vector<8x32xf32>, vector<10x8xf32> -> vector<10x8xf32>
    %c8_108 = arith.constant 8 : index
    %c0_109 = arith.constant 0 : index
    %180 = vector.load %arg8[%c8_108, %c0_109] : memref<12x8xf32, #tpu.memory_space<vmem>>, vector<1x8xf32>
    %181 = vector.broadcast %180 : vector<1x8xf32> to vector<10x8xf32>
    %182 = arith.addf %179, %181 : vector<10x8xf32>
    %cst_110 = arith.constant dense<0.000000e+00> : vector<8x10xf32>
    %183 = tpu.matmul %174, %178, %cst_110 {dimension_numbers = #tpu.dot_dimension_numbers<[1], [1], [0], [0], [0, 0, 1, 0], [], []>} : vector<8x8xf32>, vector<10x8xf32>, vector<8x10xf32> -> vector<8x10xf32>
    %cst_111 = arith.constant 0.353553385 : f32
    %184 = vector.broadcast %cst_111 : f32 to vector<8x10xf32>
    %185 = arith.mulf %183, %184 : vector<8x10xf32>
    %cst_112 = arith.constant dense<0xFF800000> : vector<8xf32>
    %186 = vector.multi_reduction <maximumf>, %185, %cst_112 [1] : vector<8x10xf32> to vector<8xf32>
    %187 = vector.shape_cast %186 : vector<8xf32> to vector<8x1xf32>
    %188 = vector.broadcast %187 : vector<8x1xf32> to vector<8x10xf32>
    %189 = arith.subf %185, %188 : vector<8x10xf32>
    %190 = math.exp %189 : vector<8x10xf32>
    %cst_113 = arith.constant dense<0.000000e+00> : vector<8xf32>
    %191 = vector.multi_reduction <add>, %190, %cst_113 [1] : vector<8x10xf32> to vector<8xf32>
    %192 = vector.shape_cast %191 : vector<8xf32> to vector<8x1xf32>
    %193 = tpu.reciprocal %192 {approx = true} : vector<8x1xf32> -> vector<8x1xf32>
    %194 = vector.broadcast %193 : vector<8x1xf32> to vector<8x10xf32>
    %195 = arith.mulf %190, %194 : vector<8x10xf32>
    %cst_114 = arith.constant dense<0.000000e+00> : vector<8x8xf32>
    %196 = tpu.matmul %195, %182, %cst_114 {dimension_numbers = #tpu.dot_dimension_numbers<[1], [0], [0], [1], [0, 0, 1, 1], [], []>} : vector<8x10xf32>, vector<10x8xf32>, vector<8x8xf32> -> vector<8x8xf32>
    %c0_115 = arith.constant 0 : index
    %c0_116 = arith.constant 0 : index
    %197 = vector.load %arg9[%c0_115, %c0_116] : memref<32x32xf32, #tpu.memory_space<vmem>>, vector<8x32xf32>
    %cst_117 = arith.constant dense<0.000000e+00> : vector<8x32xf32>
    %198 = tpu.matmul %196, %197, %cst_117 {dimension_numbers = #tpu.dot_dimension_numbers<[1], [0], [0], [1], [0, 0, 1, 1], [], []>} : vector<8x8xf32>, vector<8x32xf32>, vector<8x32xf32> -> vector<8x32xf32>
    %199 = arith.addf %167, %198 : vector<8x32xf32>
    %c8_118 = arith.constant 8 : index
    %c0_119 = arith.constant 0 : index
    %200 = vector.load %arg7[%c8_118, %c0_119] : memref<96x32xf32, #tpu.memory_space<vmem>>, vector<8x32xf32>
    %c40_120 = arith.constant 40 : index
    %c0_121 = arith.constant 0 : index
    %201 = vector.load %arg7[%c40_120, %c0_121] : memref<96x32xf32, #tpu.memory_space<vmem>>, vector<8x32xf32>
    %c72_122 = arith.constant 72 : index
    %c0_123 = arith.constant 0 : index
    %202 = vector.load %arg7[%c72_122, %c0_123] : memref<96x32xf32, #tpu.memory_space<vmem>>, vector<8x32xf32>
    %cst_124 = arith.constant dense<0.000000e+00> : vector<8x8xf32>
    %203 = tpu.matmul %166, %200, %cst_124 {dimension_numbers = #tpu.dot_dimension_numbers<[1], [1], [0], [0], [0, 0, 1, 0], [], []>} : vector<8x32xf32>, vector<8x32xf32>, vector<8x8xf32> -> vector<8x8xf32>
    %c1_125 = arith.constant 1 : index
    %c0_126 = arith.constant 0 : index
    %204 = vector.load %arg8[%c1_125, %c0_126] : memref<12x8xf32, #tpu.memory_space<vmem>>, vector<1x8xf32>
    %205 = vector.broadcast %204 : vector<1x8xf32> to vector<8x8xf32>
    %206 = arith.addf %203, %205 : vector<8x8xf32>
    %cst_127 = arith.constant dense<0.000000e+00> : vector<10x8xf32>
    %207 = tpu.matmul %11, %201, %cst_127 {dimension_numbers = #tpu.dot_dimension_numbers<[1], [1], [0], [0], [0, 0, 1, 0], [], []>} : vector<10x32xf32>, vector<8x32xf32>, vector<10x8xf32> -> vector<10x8xf32>
    %c5_128 = arith.constant 5 : index
    %c0_129 = arith.constant 0 : index
    %208 = vector.load %arg8[%c5_128, %c0_129] : memref<12x8xf32, #tpu.memory_space<vmem>>, vector<1x8xf32>
    %209 = vector.broadcast %208 : vector<1x8xf32> to vector<10x8xf32>
    %210 = arith.addf %207, %209 : vector<10x8xf32>
    %cst_130 = arith.constant dense<0.000000e+00> : vector<10x8xf32>
    %211 = tpu.matmul %11, %202, %cst_130 {dimension_numbers = #tpu.dot_dimension_numbers<[1], [1], [0], [0], [0, 0, 1, 0], [], []>} : vector<10x32xf32>, vector<8x32xf32>, vector<10x8xf32> -> vector<10x8xf32>
    %c9_131 = arith.constant 9 : index
    %c0_132 = arith.constant 0 : index
    %212 = vector.load %arg8[%c9_131, %c0_132] : memref<12x8xf32, #tpu.memory_space<vmem>>, vector<1x8xf32>
    %213 = vector.broadcast %212 : vector<1x8xf32> to vector<10x8xf32>
    %214 = arith.addf %211, %213 : vector<10x8xf32>
    %cst_133 = arith.constant dense<0.000000e+00> : vector<8x10xf32>
    %215 = tpu.matmul %206, %210, %cst_133 {dimension_numbers = #tpu.dot_dimension_numbers<[1], [1], [0], [0], [0, 0, 1, 0], [], []>} : vector<8x8xf32>, vector<10x8xf32>, vector<8x10xf32> -> vector<8x10xf32>
    %cst_134 = arith.constant 0.353553385 : f32
    %216 = vector.broadcast %cst_134 : f32 to vector<8x10xf32>
    %217 = arith.mulf %215, %216 : vector<8x10xf32>
    %cst_135 = arith.constant dense<0xFF800000> : vector<8xf32>
    %218 = vector.multi_reduction <maximumf>, %217, %cst_135 [1] : vector<8x10xf32> to vector<8xf32>
    %219 = vector.shape_cast %218 : vector<8xf32> to vector<8x1xf32>
    %220 = vector.broadcast %219 : vector<8x1xf32> to vector<8x10xf32>
    %221 = arith.subf %217, %220 : vector<8x10xf32>
    %222 = math.exp %221 : vector<8x10xf32>
    %cst_136 = arith.constant dense<0.000000e+00> : vector<8xf32>
    %223 = vector.multi_reduction <add>, %222, %cst_136 [1] : vector<8x10xf32> to vector<8xf32>
    %224 = vector.shape_cast %223 : vector<8xf32> to vector<8x1xf32>
    %225 = tpu.reciprocal %224 {approx = true} : vector<8x1xf32> -> vector<8x1xf32>
    %226 = vector.broadcast %225 : vector<8x1xf32> to vector<8x10xf32>
    %227 = arith.mulf %222, %226 : vector<8x10xf32>
    %cst_137 = arith.constant dense<0.000000e+00> : vector<8x8xf32>
    %228 = tpu.matmul %227, %214, %cst_137 {dimension_numbers = #tpu.dot_dimension_numbers<[1], [0], [0], [1], [0, 0, 1, 1], [], []>} : vector<8x10xf32>, vector<10x8xf32>, vector<8x8xf32> -> vector<8x8xf32>
    %c8_138 = arith.constant 8 : index
    %c0_139 = arith.constant 0 : index
    %229 = vector.load %arg9[%c8_138, %c0_139] : memref<32x32xf32, #tpu.memory_space<vmem>>, vector<8x32xf32>
    %cst_140 = arith.constant dense<0.000000e+00> : vector<8x32xf32>
    %230 = tpu.matmul %228, %229, %cst_140 {dimension_numbers = #tpu.dot_dimension_numbers<[1], [0], [0], [1], [0, 0, 1, 1], [], []>} : vector<8x8xf32>, vector<8x32xf32>, vector<8x32xf32> -> vector<8x32xf32>
    %231 = arith.addf %199, %230 : vector<8x32xf32>
    %c16_141 = arith.constant 16 : index
    %c0_142 = arith.constant 0 : index
    %232 = vector.load %arg7[%c16_141, %c0_142] : memref<96x32xf32, #tpu.memory_space<vmem>>, vector<8x32xf32>
    %c48_143 = arith.constant 48 : index
    %c0_144 = arith.constant 0 : index
    %233 = vector.load %arg7[%c48_143, %c0_144] : memref<96x32xf32, #tpu.memory_space<vmem>>, vector<8x32xf32>
    %c80_145 = arith.constant 80 : index
    %c0_146 = arith.constant 0 : index
    %234 = vector.load %arg7[%c80_145, %c0_146] : memref<96x32xf32, #tpu.memory_space<vmem>>, vector<8x32xf32>
    %cst_147 = arith.constant dense<0.000000e+00> : vector<8x8xf32>
    %235 = tpu.matmul %166, %232, %cst_147 {dimension_numbers = #tpu.dot_dimension_numbers<[1], [1], [0], [0], [0, 0, 1, 0], [], []>} : vector<8x32xf32>, vector<8x32xf32>, vector<8x8xf32> -> vector<8x8xf32>
    %c2_148 = arith.constant 2 : index
    %c0_149 = arith.constant 0 : index
    %236 = vector.load %arg8[%c2_148, %c0_149] : memref<12x8xf32, #tpu.memory_space<vmem>>, vector<1x8xf32>
    %237 = vector.broadcast %236 : vector<1x8xf32> to vector<8x8xf32>
    %238 = arith.addf %235, %237 : vector<8x8xf32>
    %cst_150 = arith.constant dense<0.000000e+00> : vector<10x8xf32>
    %239 = tpu.matmul %11, %233, %cst_150 {dimension_numbers = #tpu.dot_dimension_numbers<[1], [1], [0], [0], [0, 0, 1, 0], [], []>} : vector<10x32xf32>, vector<8x32xf32>, vector<10x8xf32> -> vector<10x8xf32>
    %c6_151 = arith.constant 6 : index
    %c0_152 = arith.constant 0 : index
    %240 = vector.load %arg8[%c6_151, %c0_152] : memref<12x8xf32, #tpu.memory_space<vmem>>, vector<1x8xf32>
    %241 = vector.broadcast %240 : vector<1x8xf32> to vector<10x8xf32>
    %242 = arith.addf %239, %241 : vector<10x8xf32>
    %cst_153 = arith.constant dense<0.000000e+00> : vector<10x8xf32>
    %243 = tpu.matmul %11, %234, %cst_153 {dimension_numbers = #tpu.dot_dimension_numbers<[1], [1], [0], [0], [0, 0, 1, 0], [], []>} : vector<10x32xf32>, vector<8x32xf32>, vector<10x8xf32> -> vector<10x8xf32>
    %c10_154 = arith.constant 10 : index
    %c0_155 = arith.constant 0 : index
    %244 = vector.load %arg8[%c10_154, %c0_155] : memref<12x8xf32, #tpu.memory_space<vmem>>, vector<1x8xf32>
    %245 = vector.broadcast %244 : vector<1x8xf32> to vector<10x8xf32>
    %246 = arith.addf %243, %245 : vector<10x8xf32>
    %cst_156 = arith.constant dense<0.000000e+00> : vector<8x10xf32>
    %247 = tpu.matmul %238, %242, %cst_156 {dimension_numbers = #tpu.dot_dimension_numbers<[1], [1], [0], [0], [0, 0, 1, 0], [], []>} : vector<8x8xf32>, vector<10x8xf32>, vector<8x10xf32> -> vector<8x10xf32>
    %cst_157 = arith.constant 0.353553385 : f32
    %248 = vector.broadcast %cst_157 : f32 to vector<8x10xf32>
    %249 = arith.mulf %247, %248 : vector<8x10xf32>
    %cst_158 = arith.constant dense<0xFF800000> : vector<8xf32>
    %250 = vector.multi_reduction <maximumf>, %249, %cst_158 [1] : vector<8x10xf32> to vector<8xf32>
    %251 = vector.shape_cast %250 : vector<8xf32> to vector<8x1xf32>
    %252 = vector.broadcast %251 : vector<8x1xf32> to vector<8x10xf32>
    %253 = arith.subf %249, %252 : vector<8x10xf32>
    %254 = math.exp %253 : vector<8x10xf32>
    %cst_159 = arith.constant dense<0.000000e+00> : vector<8xf32>
    %255 = vector.multi_reduction <add>, %254, %cst_159 [1] : vector<8x10xf32> to vector<8xf32>
    %256 = vector.shape_cast %255 : vector<8xf32> to vector<8x1xf32>
    %257 = tpu.reciprocal %256 {approx = true} : vector<8x1xf32> -> vector<8x1xf32>
    %258 = vector.broadcast %257 : vector<8x1xf32> to vector<8x10xf32>
    %259 = arith.mulf %254, %258 : vector<8x10xf32>
    %cst_160 = arith.constant dense<0.000000e+00> : vector<8x8xf32>
    %260 = tpu.matmul %259, %246, %cst_160 {dimension_numbers = #tpu.dot_dimension_numbers<[1], [0], [0], [1], [0, 0, 1, 1], [], []>} : vector<8x10xf32>, vector<10x8xf32>, vector<8x8xf32> -> vector<8x8xf32>
    %c16_161 = arith.constant 16 : index
    %c0_162 = arith.constant 0 : index
    %261 = vector.load %arg9[%c16_161, %c0_162] : memref<32x32xf32, #tpu.memory_space<vmem>>, vector<8x32xf32>
    %cst_163 = arith.constant dense<0.000000e+00> : vector<8x32xf32>
    %262 = tpu.matmul %260, %261, %cst_163 {dimension_numbers = #tpu.dot_dimension_numbers<[1], [0], [0], [1], [0, 0, 1, 1], [], []>} : vector<8x8xf32>, vector<8x32xf32>, vector<8x32xf32> -> vector<8x32xf32>
    %263 = arith.addf %231, %262 : vector<8x32xf32>
    %c24_164 = arith.constant 24 : index
    %c0_165 = arith.constant 0 : index
    %264 = vector.load %arg7[%c24_164, %c0_165] : memref<96x32xf32, #tpu.memory_space<vmem>>, vector<8x32xf32>
    %c56_166 = arith.constant 56 : index
    %c0_167 = arith.constant 0 : index
    %265 = vector.load %arg7[%c56_166, %c0_167] : memref<96x32xf32, #tpu.memory_space<vmem>>, vector<8x32xf32>
    %c88_168 = arith.constant 88 : index
    %c0_169 = arith.constant 0 : index
    %266 = vector.load %arg7[%c88_168, %c0_169] : memref<96x32xf32, #tpu.memory_space<vmem>>, vector<8x32xf32>
    %cst_170 = arith.constant dense<0.000000e+00> : vector<8x8xf32>
    %267 = tpu.matmul %166, %264, %cst_170 {dimension_numbers = #tpu.dot_dimension_numbers<[1], [1], [0], [0], [0, 0, 1, 0], [], []>} : vector<8x32xf32>, vector<8x32xf32>, vector<8x8xf32> -> vector<8x8xf32>
    %c3_171 = arith.constant 3 : index
    %c0_172 = arith.constant 0 : index
    %268 = vector.load %arg8[%c3_171, %c0_172] : memref<12x8xf32, #tpu.memory_space<vmem>>, vector<1x8xf32>
    %269 = vector.broadcast %268 : vector<1x8xf32> to vector<8x8xf32>
    %270 = arith.addf %267, %269 : vector<8x8xf32>
    %cst_173 = arith.constant dense<0.000000e+00> : vector<10x8xf32>
    %271 = tpu.matmul %11, %265, %cst_173 {dimension_numbers = #tpu.dot_dimension_numbers<[1], [1], [0], [0], [0, 0, 1, 0], [], []>} : vector<10x32xf32>, vector<8x32xf32>, vector<10x8xf32> -> vector<10x8xf32>
    %c7_174 = arith.constant 7 : index
    %c0_175 = arith.constant 0 : index
    %272 = vector.load %arg8[%c7_174, %c0_175] : memref<12x8xf32, #tpu.memory_space<vmem>>, vector<1x8xf32>
    %273 = vector.broadcast %272 : vector<1x8xf32> to vector<10x8xf32>
    %274 = arith.addf %271, %273 : vector<10x8xf32>
    %cst_176 = arith.constant dense<0.000000e+00> : vector<10x8xf32>
    %275 = tpu.matmul %11, %266, %cst_176 {dimension_numbers = #tpu.dot_dimension_numbers<[1], [1], [0], [0], [0, 0, 1, 0], [], []>} : vector<10x32xf32>, vector<8x32xf32>, vector<10x8xf32> -> vector<10x8xf32>
    %c11_177 = arith.constant 11 : index
    %c0_178 = arith.constant 0 : index
    %276 = vector.load %arg8[%c11_177, %c0_178] : memref<12x8xf32, #tpu.memory_space<vmem>>, vector<1x8xf32>
    %277 = vector.broadcast %276 : vector<1x8xf32> to vector<10x8xf32>
    %278 = arith.addf %275, %277 : vector<10x8xf32>
    %cst_179 = arith.constant dense<0.000000e+00> : vector<8x10xf32>
    %279 = tpu.matmul %270, %274, %cst_179 {dimension_numbers = #tpu.dot_dimension_numbers<[1], [1], [0], [0], [0, 0, 1, 0], [], []>} : vector<8x8xf32>, vector<10x8xf32>, vector<8x10xf32> -> vector<8x10xf32>
    %cst_180 = arith.constant 0.353553385 : f32
    %280 = vector.broadcast %cst_180 : f32 to vector<8x10xf32>
    %281 = arith.mulf %279, %280 : vector<8x10xf32>
    %cst_181 = arith.constant dense<0xFF800000> : vector<8xf32>
    %282 = vector.multi_reduction <maximumf>, %281, %cst_181 [1] : vector<8x10xf32> to vector<8xf32>
    %283 = vector.shape_cast %282 : vector<8xf32> to vector<8x1xf32>
    %284 = vector.broadcast %283 : vector<8x1xf32> to vector<8x10xf32>
    %285 = arith.subf %281, %284 : vector<8x10xf32>
    %286 = math.exp %285 : vector<8x10xf32>
    %cst_182 = arith.constant dense<0.000000e+00> : vector<8xf32>
    %287 = vector.multi_reduction <add>, %286, %cst_182 [1] : vector<8x10xf32> to vector<8xf32>
    %288 = vector.shape_cast %287 : vector<8xf32> to vector<8x1xf32>
    %289 = tpu.reciprocal %288 {approx = true} : vector<8x1xf32> -> vector<8x1xf32>
    %290 = vector.broadcast %289 : vector<8x1xf32> to vector<8x10xf32>
    %291 = arith.mulf %286, %290 : vector<8x10xf32>
    %cst_183 = arith.constant dense<0.000000e+00> : vector<8x8xf32>
    %292 = tpu.matmul %291, %278, %cst_183 {dimension_numbers = #tpu.dot_dimension_numbers<[1], [0], [0], [1], [0, 0, 1, 1], [], []>} : vector<8x10xf32>, vector<10x8xf32>, vector<8x8xf32> -> vector<8x8xf32>
    %c24_184 = arith.constant 24 : index
    %c0_185 = arith.constant 0 : index
    %293 = vector.load %arg9[%c24_184, %c0_185] : memref<32x32xf32, #tpu.memory_space<vmem>>, vector<8x32xf32>
    %cst_186 = arith.constant dense<0.000000e+00> : vector<8x32xf32>
    %294 = tpu.matmul %292, %293, %cst_186 {dimension_numbers = #tpu.dot_dimension_numbers<[1], [0], [0], [1], [0, 0, 1, 1], [], []>} : vector<8x8xf32>, vector<8x32xf32>, vector<8x32xf32> -> vector<8x32xf32>
    %295 = arith.addf %263, %294 : vector<8x32xf32>
    %c0_187 = arith.constant 0 : index
    %c0_188 = arith.constant 0 : index
    %296 = vector.load %arg10[%c0_187, %c0_188] : memref<1x32xf32, #tpu.memory_space<vmem>>, vector<1x32xf32>
    %297 = vector.broadcast %296 : vector<1x32xf32> to vector<8x32xf32>
    %298 = arith.addf %295, %297 : vector<8x32xf32>
    %c0_189 = arith.constant 0 : index
    %c0_190 = arith.constant 0 : index
    %299 = vector.load %arg17[%c0_189, %c0_190] : memref<1x32xf32, #tpu.memory_space<vmem>>, vector<1x32xf32>
    %c0_191 = arith.constant 0 : index
    %c0_192 = arith.constant 0 : index
    %300 = vector.load %arg18[%c0_191, %c0_192] : memref<1x32xf32, #tpu.memory_space<vmem>>, vector<1x32xf32>
    %301 = arith.addf %166, %298 : vector<8x32xf32>
    %cst_193 = arith.constant dense<0.000000e+00> : vector<8xf32>
    %302 = vector.multi_reduction <add>, %301, %cst_193 [1] : vector<8x32xf32> to vector<8xf32>
    %303 = vector.shape_cast %302 : vector<8xf32> to vector<8x1xf32>
    %cst_194 = arith.constant 3.200000e+01 : f32
    %304 = vector.broadcast %cst_194 : f32 to vector<8x1xf32>
    %305 = arith.divf %303, %304 : vector<8x1xf32>
    %306 = vector.broadcast %305 : vector<8x1xf32> to vector<8x32xf32>
    %307 = arith.subf %301, %306 : vector<8x32xf32>
    %308 = arith.mulf %307, %307 : vector<8x32xf32>
    %cst_195 = arith.constant dense<0.000000e+00> : vector<8xf32>
    %309 = vector.multi_reduction <add>, %308, %cst_195 [1] : vector<8x32xf32> to vector<8xf32>
    %310 = vector.shape_cast %309 : vector<8xf32> to vector<8x1xf32>
    %cst_196 = arith.constant 3.200000e+01 : f32
    %311 = vector.broadcast %cst_196 : f32 to vector<8x1xf32>
    %312 = arith.divf %310, %311 : vector<8x1xf32>
    %cst_197 = arith.constant 9.99999974E-6 : f32
    %313 = vector.broadcast %cst_197 : f32 to vector<8x1xf32>
    %314 = arith.addf %312, %313 : vector<8x1xf32>
    %315 = math.rsqrt %314 : vector<8x1xf32>
    %316 = vector.broadcast %315 : vector<8x1xf32> to vector<8x32xf32>
    %317 = arith.mulf %307, %316 : vector<8x32xf32>
    %318 = vector.broadcast %299 : vector<1x32xf32> to vector<8x32xf32>
    %319 = arith.mulf %317, %318 : vector<8x32xf32>
    %320 = vector.broadcast %300 : vector<1x32xf32> to vector<8x32xf32>
    %321 = arith.addf %319, %320 : vector<8x32xf32>
    %c0_198 = arith.constant 0 : index
    %c0_199 = arith.constant 0 : index
    %322 = vector.load %arg11[%c0_198, %c0_199] : memref<64x32xf32, #tpu.memory_space<vmem>>, vector<64x32xf32>
    %cst_200 = arith.constant dense<0.000000e+00> : vector<8x64xf32>
    %323 = tpu.matmul %321, %322, %cst_200 {dimension_numbers = #tpu.dot_dimension_numbers<[1], [1], [0], [0], [0, 0, 1, 0], [], []>} : vector<8x32xf32>, vector<64x32xf32>, vector<8x64xf32> -> vector<8x64xf32>
    %c0_201 = arith.constant 0 : index
    %c0_202 = arith.constant 0 : index
    %324 = vector.load %arg12[%c0_201, %c0_202] : memref<1x64xf32, #tpu.memory_space<vmem>>, vector<1x64xf32>
    %325 = vector.broadcast %324 : vector<1x64xf32> to vector<8x64xf32>
    %326 = arith.addf %323, %325 : vector<8x64xf32>
    %cst_203 = arith.constant 0.000000e+00 : f32
    %327 = vector.broadcast %cst_203 : f32 to vector<8x64xf32>
    %328 = arith.maximumf %326, %327 : vector<8x64xf32>
    %c0_204 = arith.constant 0 : index
    %c0_205 = arith.constant 0 : index
    %329 = vector.load %arg13[%c0_204, %c0_205] : memref<32x64xf32, #tpu.memory_space<vmem>>, vector<32x64xf32>
    %cst_206 = arith.constant dense<0.000000e+00> : vector<8x32xf32>
    %330 = tpu.matmul %328, %329, %cst_206 {dimension_numbers = #tpu.dot_dimension_numbers<[1], [1], [0], [0], [0, 0, 1, 0], [], []>} : vector<8x64xf32>, vector<32x64xf32>, vector<8x32xf32> -> vector<8x32xf32>
    %c0_207 = arith.constant 0 : index
    %c0_208 = arith.constant 0 : index
    %331 = vector.load %arg14[%c0_207, %c0_208] : memref<1x32xf32, #tpu.memory_space<vmem>>, vector<1x32xf32>
    %332 = vector.broadcast %331 : vector<1x32xf32> to vector<8x32xf32>
    %333 = arith.addf %330, %332 : vector<8x32xf32>
    %c0_209 = arith.constant 0 : index
    %c0_210 = arith.constant 0 : index
    %334 = vector.load %arg19[%c0_209, %c0_210] : memref<1x32xf32, #tpu.memory_space<vmem>>, vector<1x32xf32>
    %c0_211 = arith.constant 0 : index
    %c0_212 = arith.constant 0 : index
    %335 = vector.load %arg20[%c0_211, %c0_212] : memref<1x32xf32, #tpu.memory_space<vmem>>, vector<1x32xf32>
    %336 = arith.addf %321, %333 : vector<8x32xf32>
    %cst_213 = arith.constant dense<0.000000e+00> : vector<8xf32>
    %337 = vector.multi_reduction <add>, %336, %cst_213 [1] : vector<8x32xf32> to vector<8xf32>
    %338 = vector.shape_cast %337 : vector<8xf32> to vector<8x1xf32>
    %cst_214 = arith.constant 3.200000e+01 : f32
    %339 = vector.broadcast %cst_214 : f32 to vector<8x1xf32>
    %340 = arith.divf %338, %339 : vector<8x1xf32>
    %341 = vector.broadcast %340 : vector<8x1xf32> to vector<8x32xf32>
    %342 = arith.subf %336, %341 : vector<8x32xf32>
    %343 = arith.mulf %342, %342 : vector<8x32xf32>
    %cst_215 = arith.constant dense<0.000000e+00> : vector<8xf32>
    %344 = vector.multi_reduction <add>, %343, %cst_215 [1] : vector<8x32xf32> to vector<8xf32>
    %345 = vector.shape_cast %344 : vector<8xf32> to vector<8x1xf32>
    %cst_216 = arith.constant 3.200000e+01 : f32
    %346 = vector.broadcast %cst_216 : f32 to vector<8x1xf32>
    %347 = arith.divf %345, %346 : vector<8x1xf32>
    %cst_217 = arith.constant 9.99999974E-6 : f32
    %348 = vector.broadcast %cst_217 : f32 to vector<8x1xf32>
    %349 = arith.addf %347, %348 : vector<8x1xf32>
    %350 = math.rsqrt %349 : vector<8x1xf32>
    %351 = vector.broadcast %350 : vector<8x1xf32> to vector<8x32xf32>
    %352 = arith.mulf %342, %351 : vector<8x32xf32>
    %353 = vector.broadcast %334 : vector<1x32xf32> to vector<8x32xf32>
    %354 = arith.mulf %352, %353 : vector<8x32xf32>
    %355 = vector.broadcast %335 : vector<1x32xf32> to vector<8x32xf32>
    %356 = arith.addf %354, %355 : vector<8x32xf32>
    %c0_218 = arith.constant 0 : index
    %c0_219 = arith.constant 0 : index
    %c0_220 = arith.constant 0 : index
    %357 = vector.load %arg21[%c0_218, %c0_219, %c0_220] : memref<1x8x32xf32, #tpu.memory_space<vmem>>, vector<1x8x32xf32>
    %358 = vector.shape_cast %357 : vector<1x8x32xf32> to vector<8x32xf32>
    %359 = vector.shape_cast %356 : vector<8x32xf32> to vector<1x8x32xf32>
    tpu.vector_store %arg21[%c0_218, %c0_219, %c0_220], %359 {strides = array<i32>} : memref<1x8x32xf32, #tpu.memory_space<vmem>>, vector<1x8x32xf32>,
    return
  }
  func.func @transform_0(%arg0: i32) -> (i32, i32, i32) {
    %c0_i32 = arith.constant 0 : i32
    %c0_i32_0 = arith.constant 0 : i32
    %c0_i32_1 = arith.constant 0 : i32
    %c0_i32_2 = arith.constant 0 : i32
    return %c0_i32, %c0_i32_0, %c0_i32_1 : i32, i32, i32
  }
  func.func @transform_1(%arg0: i32) -> (i32, i32, i32) {
    %c0_i32 = arith.constant 0 : i32
    %c0_i32_0 = arith.constant 0 : i32
    %c0_i32_1 = arith.constant 0 : i32
    %c0_i32_2 = arith.constant 0 : i32
    return %c0_i32, %c0_i32_0, %c0_i32_1 : i32, i32, i32
  }
  func.func @transform_2(%arg0: i32) -> (i32, i32) {
    %c0_i32 = arith.constant 0 : i32
    %c0_i32_0 = arith.constant 0 : i32
    %c0_i32_1 = arith.constant 0 : i32
    return %c0_i32, %c0_i32_0 : i32, i32
  }
  func.func @transform_3(%arg0: i32) -> (i32, i32) {
    %c0_i32 = arith.constant 0 : i32
    %c0_i32_0 = arith.constant 0 : i32
    %c0_i32_1 = arith.constant 0 : i32
    return %c0_i32, %c0_i32_0 : i32, i32
  }
  func.func @transform_4(%arg0: i32) -> (i32, i32) {
    %c0_i32 = arith.constant 0 : i32
    %c0_i32_0 = arith.constant 0 : i32
    %c0_i32_1 = arith.constant 0 : i32
    return %c0_i32, %c0_i32_0 : i32, i32
  }
  func.func @transform_5(%arg0: i32) -> (i32, i32) {
    %c0_i32 = arith.constant 0 : i32
    %c0_i32_0 = arith.constant 0 : i32
    %c0_i32_1 = arith.constant 0 : i32
    return %c0_i32, %c0_i32_0 : i32, i32
  }
  func.func @transform_6(%arg0: i32) -> (i32, i32) {
    %c0_i32 = arith.constant 0 : i32
    %c0_i32_0 = arith.constant 0 : i32
    %c0_i32_1 = arith.constant 0 : i32
    return %c0_i32, %c0_i32_0 : i32, i32
  }
  func.func @transform_7(%arg0: i32) -> (i32, i32) {
    %c0_i32 = arith.constant 0 : i32
    %c0_i32_0 = arith.constant 0 : i32
    %c0_i32_1 = arith.constant 0 : i32
    return %c0_i32, %c0_i32_0 : i32, i32
  }
  func.func @transform_8(%arg0: i32) -> (i32, i32) {
    %c0_i32 = arith.constant 0 : i32
    %c0_i32_0 = arith.constant 0 : i32
    %c0_i32_1 = arith.constant 0 : i32
    return %c0_i32, %c0_i32_0 : i32, i32
  }
  func.func @transform_9(%arg0: i32) -> (i32, i32) {
    %c0_i32 = arith.constant 0 : i32
    %c0_i32_0 = arith.constant 0 : i32
    %c0_i32_1 = arith.constant 0 : i32
    return %c0_i32, %c0_i32_0 : i32, i32
  }
  func.func @transform_10(%arg0: i32) -> (i32, i32) {
    %c0_i32 = arith.constant 0 : i32
    %c0_i32_0 = arith.constant 0 : i32
    %c0_i32_1 = arith.constant 0 : i32
    return %c0_i32, %c0_i32_0 : i32, i32
  }
  func.func @transform_11(%arg0: i32) -> (i32, i32) {
    %c0_i32 = arith.constant 0 : i32
    %c0_i32_0 = arith.constant 0 : i32
    %c0_i32_1 = arith.constant 0 : i32
    return %c0_i32, %c0_i32_0 : i32, i32
  }
  func.func @transform_12(%arg0: i32) -> (i32, i32) {
    %c0_i32 = arith.constant 0 : i32
    %c0_i32_0 = arith.constant 0 : i32
    %c0_i32_1 = arith.constant 0 : i32
    return %c0_i32, %c0_i32_0 : i32, i32
  }
  func.func @transform_13(%arg0: i32) -> (i32, i32) {
    %c0_i32 = arith.constant 0 : i32
    %c0_i32_0 = arith.constant 0 : i32
    %c0_i32_1 = arith.constant 0 : i32
    return %c0_i32, %c0_i32_0 : i32, i32
  }
  func.func @transform_14(%arg0: i32) -> (i32, i32) {
    %c0_i32 = arith.constant 0 : i32
    %c0_i32_0 = arith.constant 0 : i32
    %c0_i32_1 = arith.constant 0 : i32
    return %c0_i32, %c0_i32_0 : i32, i32
  }
  func.func @transform_15(%arg0: i32) -> (i32, i32) {
    %c0_i32 = arith.constant 0 : i32
    %c0_i32_0 = arith.constant 0 : i32
    %c0_i32_1 = arith.constant 0 : i32
    return %c0_i32, %c0_i32_0 : i32, i32
  }
  func.func @transform_16(%arg0: i32) -> (i32, i32) {
    %c0_i32 = arith.constant 0 : i32
    %c0_i32_0 = arith.constant 0 : i32
    %c0_i32_1 = arith.constant 0 : i32
    return %c0_i32, %c0_i32_0 : i32, i32
  }
  func.func @transform_17(%arg0: i32) -> (i32, i32) {
    %c0_i32 = arith.constant 0 : i32
    %c0_i32_0 = arith.constant 0 : i32
    %c0_i32_1 = arith.constant 0 : i32
    return %c0_i32, %c0_i32_0 : i32, i32
  }
  func.func @transform_18(%arg0: i32) -> (i32, i32) {
    %c0_i32 = arith.constant 0 : i32
    %c0_i32_0 = arith.constant 0 : i32
    %c0_i32_1 = arith.constant 0 : i32
    return %c0_i32, %c0_i32_0 : i32, i32
  }
  func.func @transform_19(%arg0: i32) -> (i32, i32) {
    %c0_i32 = arith.constant 0 : i32
    %c0_i32_0 = arith.constant 0 : i32
    %c0_i32_1 = arith.constant 0 : i32
    return %c0_i32, %c0_i32_0 : i32, i32
  }
  func.func @transform_20(%arg0: i32) -> (i32, i32, i32) {
    %c0_i32 = arith.constant 0 : i32
    %c0_i32_0 = arith.constant 0 : i32
    %c0_i32_1 = arith.constant 0 : i32
    return %arg0, %c0_i32, %c0_i32_0 : i32, i32, i32
  }
}

</mosaic_0001>

<bundles_post_ra>
// kernel: transformer_decoder_layer.1
= control target key start
LH: loop header
LB: loop body
LE: loop exit
PB: predicated region body
PF: predicated region fallthrough
CT: control target
= control target key end

     0   :  { %s7153_s0 = inlined_call_operand.vmem [shape: f32[8,2,32], index: 0, kind: input, shape index: {}]   ;;  %s7154_s1 = inlined_call_operand.vmem [shape: f32[10,2,32], index: 1, kind: input, shape index: {}]   ;;  %s7155_s2 = inlined_call_operand.vmem [shape: f32[96,32], index: 2, kind: input, shape index: {}]   ;;  %s7156_s3 = inlined_call_operand.vmem [shape: f32[12,8], index: 3, kind: input, shape index: {}]   ;;  %s7157_s4 = inlined_call_operand.vmem [shape: f32[32,32], index: 4, kind: input, shape index: {}]   ;;  %s7158_s5 = inlined_call_operand.vmem [shape: f32[1,32], index: 5, kind: input, shape index: {}]   ;;  %s7159_s6 = inlined_call_operand.vmem [shape: f32[96,32], index: 6, kind: input, shape index: {}]   ;;  %s7160_s7 = inlined_call_operand.vmem [shape: f32[12,8], index: 7, kind: input, shape index: {}]   ;;  %s7161_s8 = inlined_call_operand.vmem [shape: f32[32,32], index: 8, kind: input, shape index: {}]   ;;  %s7162_s9 = inlined_call_operand.vmem [shape: f32[1,32], index: 9, kind: input, shape index: {}]   ;;  %s7163_s10 = inlined_call_operand.vmem [shape: f32[64,32], index: 10, kind: input, shape index: {}]   ;;  %s7164_s11 = inlined_call_operand.vmem [shape: f32[1,64], index: 11, kind: input, shape index: {}]   ;;  %s7165_s12 = inlined_call_operand.vmem [shape: f32[32,64], index: 12, kind: input, shape index: {}]   ;;  %s7166_s13 = inlined_call_operand.vmem [shape: f32[1,32], index: 13, kind: input, shape index: {}]   ;;  %s7167_s14 = inlined_call_operand.vmem [shape: f32[1,32], index: 14, kind: input, shape index: {}]   ;;  %s7168_s15 = inlined_call_operand.vmem [shape: f32[1,32], index: 15, kind: input, shape index: {}]   ;;  %s7169_s16 = inlined_call_operand.vmem [shape: f32[1,32], index: 16, kind: input, shape index: {}]   ;;  %s7170_s17 = inlined_call_operand.vmem [shape: f32[1,32], index: 17, kind: input, shape index: {}]   ;;  %s7171_s18 = inlined_call_operand.vmem [shape: f32[1,32], index: 18, kind: input, shape index: {}]   ;;  %s7172_s19 = inlined_call_operand.vmem [shape: f32[1,32], index: 19, kind: input, shape index: {}]   ;;  %s7173_s20 = inlined_call_operand.vmem [shape: f32[2,8,32], index: 20, kind: output, shape index: {}]  }
   0x1   :  { %7181 = sst [smem:[#allocation3_spill]] %s7153_s0 }
   0x2   :  { %7182 = sst [smem:[#allocation4_spill]] %s7154_s1  ;;  %s6196_s1 = smov 0  }
   0x3   :  { %7183 = sst [smem:[#allocation5_spill]] %s7155_s2 }
   0x4   :  { %7184 = sst [smem:[#allocation6_spill]] %s7156_s3 }
   0x5   :  { %7185 = sst [smem:[#allocation7_spill]] %s7157_s4 }
   0x6   :  { %7186 = sst [smem:[#allocation8_spill]] %s7158_s5 }
   0x7   :  { %7187 = sst [smem:[#allocation9_spill]] %s7173_s20 }
   0x8 LB: > { %7188 = sst [smem:[#allocation2_spill]] %s6085_s1  ;;  %s6202_s22 = sadd.s32 4294967295, %s6085_s1   ;;  %s6085_s1 = sphi %s6196_s1, %s30_s1  }
   0x9   : > { %p5413_p0 = scmp.ge.s32.totalorder %s6085_s1, 1  ;;  %p552_p1 = scmp.lt.s32.totalorder %s6085_s1, 3 }
   0xb   : > { %p553_p2 = pnand %p5413_p0, %p552_p1 }
   0xc   : > { %s7189_s2 = sld [smem:[#allocation5_spill]] (!%p553_p2)  ;;  %vm703_vm0 = vcmask (!%p553_p2), 261120   ;;  %v6087_v2 = vmov (!%p553_p2), 0.0   ;;  %p626_p3 = scmp.eq.s32.totalorder (!%p553_p2), %s6202_s22, 1  ;;  %vm6088_vm1 = vmmov (!%p553_p2), 0   ;;  %vm683_vm3 = vcmask (!%p553_p2), 1041409  }
   0xd   : > { %556 = sbr.rel (%p553_p2) target bundleno = 9193 (0x23e9), region = 100  ;;  %5692 = vmatprep.subr.mxu1 (!%p553_p2), %v6087_v2  ;;  %5687 = vmatprep.subr.mxu0 (!%p553_p2), %v6087_v2  ;;  %s7190_s28 = sld [smem:[#allocation3_spill]] (!%p553_p2)  ;;  %vm686_vm4 = vcmask (!%p553_p2), 1042434   ;;  %vm689_vm5 = vcmask (!%p553_p2), 1043459   ;;  %vm692_vm6 = vcmask (!%p553_p2), 1044484   ;;  %vm695_vm7 = vcmask (!%p553_p2), 1045509  }
   0xe   : > { %5694 = vmatprep.mubr.msk.f32.mxu1 (!%p553_p2), %vm6088_vm1, %v6087_v2  ;;  %5689 = vmatprep.mubr.msk.f32.mxu0 (!%p553_p2), %vm6088_vm1, %v6087_v2  ;;  %vm698_vm8 = vcmask (!%p553_p2), 1046534   ;;  %vm701_vm9 = vcmask (!%p553_p2), 1047559   ;;  %s7193_s25 = sld [smem:[#allocation6_spill]] (!%p553_p2)  ;;  %vm935_vm10 = vcmask (!%p553_p2), 64512   ;;  %s7194_s23 = sld [smem:[#allocation7_spill]] (!%p553_p2)  ;;  %v6089_v18 = vmov (!%p553_p2), 0.0|0.0  }
   0xf   : > { %s7195_s5 = sld [smem:[#allocation8_spill]] (!%p553_p2)  ;;  %s7196_s1 = sld [smem:[#allocation4_spill]] (!%p553_p2)  ;;  %vm6750_vm11 = vmpackc.low (!%p553_p2), %vm935_vm10, %vm935_vm10  ;;  %vm3145_vm12 = vcmask (!%p553_p2), 80896   ;;  %vm3160_vm13 = vcmask (!%p553_p2), 1041408   ;;  %vm6090_vm14 = vmmov (!%p553_p2), 1  }
  0x10   : > { %vm6781_vm15 = vmpackc.low (!%p553_p2), %vm3160_vm13, %vm6090_vm14  ;;  %p604_p4 = scmp.lt.s32.totalorder (!%p553_p2), %s6202_s22, 1  ;;  %s7204_s0 = sld [smem:[#allocation9_spill]] (!%p553_p2) }
  0x12   : > { %v667_v0 = vld [vmem:[%s7189_s2 + $0x20] sm:$0xff] (!%p553_p2) }
  0x13   : > { %v666_v1 = vld [vmem:[%s7189_s2] sm:$0xff] (!%p553_p2)  ;;  %5693 = vmatpush3.xpose.msk.msra.mxu1 (!%p553_p2), %vm703_vm0, %v667_v0  ;;  %v612_v7 = vld [vmem:[%s7190_s28 + $0x8] sm:$0x1] (!%p553_p2)  ;;  %v613_v8 = vld [vmem:[%s7190_s28 + $0xa] sm:$0x1] (!%p553_p2) }
  0x14   : > { %5688 = vmatpush3.xpose.msk.msra.mxu0 %vm703_vm0, %v666_v1  ;;  %5702 = vmatprep.subr.mxu1 %v6087_v2  ;;  %v609_v3 = vld [vmem:[%s7190_s28 + $0x2] sm:$0x1]  ;;  %v610_v4 = vld [vmem:[%s7190_s28 + $0x4] sm:$0x1]  ;;  %v611_v5 = vld [vmem:[%s7190_s28 + $0x6] sm:$0x1] }
  0x15   : > { %5697 = vmatprep.subr.mxu0 %v6087_v2  ;;  %v608_v6 = vld [vmem:[%s7190_s28] sm:$0x1]  ;;  %s635_s26 = scalar_select %p626_p3, 1, 0  ;;  %v628_v9 = vld [vmem:[%s7190_s28 + $0x3] sm:$0x1] }
  0x16   : > { %v629_v10 = vld [vmem:[%s7190_s28 + $0x5] sm:$0x1]  ;;  %v630_v11 = vld [vmem:[%s7190_s28 + $0x7] sm:$0x1]  ;;  %v627_v12 = vld [vmem:[%s7190_s28 + $0x1] sm:$0x1]  ;;  %s7197_s3 = smov %s7196_s1 }
  0x17   : > { %v631_v13 = vld [vmem:[%s7190_s28 + $0x9] sm:$0x1]  ;;  %v632_v14 = vld [vmem:[%s7190_s28 + $0xb] sm:$0x1]  ;;  %v636_v15 = vstv %s635_s26  ;;  %v614_v16 = vld [vmem:[%s7190_s28 + $0xc] sm:$0x1] }
  0x18   : > { %v633_v17 = vld [vmem:[%s7190_s28 + $0xd] sm:$0x1]  ;;  %vm6265_vm2 = vcmp.eq.s32.totalorder %v636_v15, 1  ;;  %v615_v19 = vld [vmem:[%s7190_s28 + $0xe] sm:$0x1]  ;;  %v668_v51 = vld [vmem:[%s7189_s2 + $0x40] sm:$0xff] }
  0x19   : > { %v634_v20 = vld [vmem:[%s7190_s28 + $0xf] sm:$0x1]  ;;  %v6277_v21 = vsel %vm6265_vm2, %v628_v9, %v609_v3  ;;  %v6281_v22 = vsel %vm6265_vm2, %v629_v10, %v610_v4  ;;  %v6285_v23 = vsel %vm6265_vm2, %v630_v11, %v611_v5  ;;  %v6289_v24 = vsel %vm6265_vm2, %v627_v12, %v608_v6  ;;  %v5418_v43 = vld [vmem:[%s7193_s25 + $0x4] ss:$0 sm:$0xff]  ;;  %v5415_v44 = vld [vmem:[%s7193_s25] ss:$0 sm:$0xff] }
  0x1a   : > { %v6293_v25 = vsel %vm6265_vm2, %v631_v13, %v612_v7  ;;  %v6297_v26 = vsel %vm6265_vm2, %v632_v14, %v613_v8  ;;  %v6301_v27 = vsel %vm6265_vm2, %v633_v17, %v614_v16  ;;  %v682_v28 = vrot.slane %v6277_v21, 7  ;;  %v5421_v62 = vld [vmem:[%s7193_s25 + $0x8] ss:$0 sm:$0xff]  ;;  %v5430_v11 = vld [vmem:[%s7193_s25 + $0x5] ss:$0 sm:$0xff]  ;;  %s7207_s22 = smov (!%p604_p4, %s6202_s22), 1 }
  0x1b   : > { %v685_v29 = vrot.slane %v6281_v22, 6  ;;  %v688_v30 = vrot.slane %v6285_v23, 5  ;;  %v6308_v31 = vsel %vm6265_vm2, %v634_v20, %v615_v19  ;;  %v691_v32 = vrot.slane %v6293_v25, 4  ;;  %v1098_v1 = vld [vmem:[%s7189_s2 + $0x8] sm:$0xff]  ;;  %v5427_v12 = vld [vmem:[%s7193_s25 + $0x1] ss:$0 sm:$0xff] }
  0x1c   : > { %v684_v33 = vsel %vm683_vm3, %v682_v28, %v6289_v24  ;;  %v694_v34 = vrot.slane %v6297_v26, 3  ;;  %v697_v36 = vrot.slane %v6301_v27, 2  ;;  %v700_v38 = vrot.slane %v6308_v31, 1  ;;  %v1099_v6 = vld [vmem:[%s7189_s2 + $0x28] sm:$0xff] }
  0x1d   : > { %v687_v35 = vsel %vm686_vm4, %v685_v29, %v684_v33  ;;  %v1100_v17 = vld [vmem:[%s7189_s2 + $0x48] sm:$0xff] }
  0x1e   : > { %v690_v37 = vsel %vm689_vm5, %v688_v30, %v687_v35 }
  0x1f   : > { %v693_v39 = vsel %vm692_vm6, %v691_v32, %v690_v37  ;;  %v5433_v37 = vld [vmem:[%s7193_s25 + $0x9] ss:$0 sm:$0xff] }
  0x20   : > { %v696_v40 = vsel %vm695_vm7, %v694_v34, %v693_v39 }
  0x21   : > { %v699_v41 = vsel %vm698_vm8, %v697_v36, %v696_v40  ;;  %v1496_v40 = vld [vmem:[%s7194_s23 + $0x8] sm:$0xff] }
  0x22   : > { %v6322_v42 = vsel %vm701_vm9, %v700_v38, %v699_v41 }
  0x23   : > { %5695 = vmatmul.mubr.msk.f32.vlgmr.msra.gmra.mrb[0].mxu1 %vm703_vm0, %v6322_v42  ;;  %5690 = vmatmul.mubr.msk.f32.vlgmr.msra.gmra.mrb[0].mxu0 %vm703_vm0, %v6322_v42 }
  0x24   : > { %5704 = vmatprep.mubr.msk.f32.mxu1 %vm6088_vm1, %v6087_v2  ;;  %5699 = vmatprep.mubr.msk.f32.mxu0 %vm6088_vm1, %v6087_v2 }
  0x25   : > { %5698 = vmatpush3.xpose.msk.msra.mxu0 %vm703_vm0, %v668_v51 }
  0x26   : > { %5707 = vmatprep.subr.mxu0 %v6087_v2 }
  0x28   : > { %5700 = vmatmul.mubr.msk.f32.vlgmr.msra.gmra.mrb[2].mxu0 %vm703_vm0, %v6322_v42 }
  0x29   : > { %5709 = vmatprep.mubr.msk.f32.mxu0 %vm6088_vm1, %v6087_v2 }
  0xf6   : > { %v853_v45 = vpop.f32.mrb[0].mxu1  ;;  %v775_v46 = vpop.f32.mrb[0].mxu0 }
  0xf7   : > { %v854_v47 = vadd.f32 %v5418_v43, %v853_v45  ;;  %v5696_v48 = vpop.f32.mrb[1].mxu1  ;;  %v5691_v49 = vpop.f32.mrb[1].mxu0  ;;  %v776_v50 = vadd.f32 %v5415_v44, %v775_v46  ;;  %v1097_v45 = vld [vmem:[%s7194_s23] sm:$0xff]  ;;  %v1644_v46 = vld [vmem:[%s7189_s2 + $0x30] sm:$0xff] }
  0xf9   : > { %5703 = vmatpush3.xpose.msk.msra.mxu1 %vm935_vm10, %v854_v47  ;;  %v1643_v47 = vld [vmem:[%s7189_s2 + $0x10] sm:$0xff] }
  0xfa   : > { %5712 = vmatprep.subr.mxu1 %v6087_v2 }
  0xfb   : > { %v931_v61 = vpop.f32.mrb[2].mxu0 }
  0xfc   : > { %5705 = vmatmul.mubr.msk.f32.vlgmr.msra.gmra.mrb[2].mxu1 %vm935_vm10, %v776_v50  ;;  %v5701_v63 = vpop.f32.mrb[3].mxu0  ;;  %v932_v0 = vadd.f32 %v5421_v62, %v931_v61 }
  0xfd   : > { %5714 = vmatprep.mubr.msk.f32.mxu1 %vm6088_vm1, %v6087_v2  ;;  %5713 = vmatpush3.xpose.msk.msra.mxu1 %vm703_vm0, %v1098_v1  ;;  %v1645_v63 = vld [vmem:[%s7189_s2 + $0x50] sm:$0xff] }
  0xfe   : > { %5708 = vmatpush3.msra.mxu0 %v932_v0  ;;  %5722 = vmatprep.subr.mxu1 %v6087_v2 }
  0xff   : > { %5717 = vmatprep.subr.mxu0 %v6087_v2 }
 0x100   : > { %5715 = vmatmul.mubr.msk.f32.vlgmr.msra.gmra.mrb[4].mxu1 %vm703_vm0, %v6322_v42 }
 0x101   : > { %5724 = vmatprep.mubr.msk.f32.mxu1 %vm6088_vm1, %v6087_v2  ;;  %5723 = vmatpush3.xpose.msk.msra.mxu1 %vm703_vm0, %v1100_v17 }
 0x102   : > { %5732 = vmatprep.subr.mxu1 %v6087_v2 }
 0x104   : > { %5725 = vmatmul.mubr.msk.f32.vlgmr.msra.gmra.mrb[6].mxu1 %vm703_vm0, %v6322_v42 }
 0x105   : > { %5734 = vmatprep.mubr.msk.f32.mxu1 %vm6088_vm1, %v6087_v2 }
 0x1cf   : > { %v1008_v52 = vpop.f32.mrb[2].mxu1 }
 0x1d0   : > { %v1012_v53 = vmul.f32 0.35355338, %v1008_v52  ;;  %v5706_v54 = vpop.f32.mrb[3].mxu1 }
 0x1d2   : > { %v1013_v55 = vsel %vm935_vm10, %v1012_v53, -inf }
 0x1d3   : > { %1014 = vmax.xlane.f32.xlu0 %v1013_v55  ;;  %v1175_v7 = vpop.f32.mrb[4].mxu1 }
 0x1d4   : > { %v5716_v8 = vpop.f32.mrb[5].mxu1  ;;  %v1176_v16 = vadd.f32 %v5427_v12, %v1175_v7 }
 0x1d7   : > { %v1331_v36 = vpop.f32.mrb[6].mxu1 }
 0x1d8   : > { %v5726_v38 = vpop.f32.mrb[7].mxu1  ;;  %v1332_v39 = vadd.f32 %v5433_v37, %v1331_v36  ;;  %v5457_v36 = vld [vmem:[%s7193_s25 + $0x7] ss:$0 sm:$0xff]  ;;  %v5454_v37 = vld [vmem:[%s7193_s25 + $0x3] ss:$0 sm:$0xff] }
 0x1da   : > { %5733 = vmatpush3.msra.mxu1 %v1332_v39 }
 0x1db   : > { %5742 = vmatprep.subr.mxu1 %v6087_v2 }
 0x260   : > { %v1015_v56 = vpop.xlane.xlu0 %1014 }
 0x261   : > { %v1016_v57 = vsub.f32 %v1012_v53, %v1015_v56  ;;  %v5444_v53 = vld [vmem:[%s7193_s25 + $0x6] ss:$0 sm:$0xff] }
 0x263   : > { %v1017_v58 = vmul.f32 1.442695, %v1016_v57 }
 0x265   : > { %6041 = vpow2.f32 %v1017_v58 }
 0x26f   : > { %v6042_v59 = vpop.eup %6041 }
 0x270   : > { %v1019_v60 = vsel %vm935_vm10, %v6042_v59, 0.0 }
 0x271   : > { %1020 = vadd.xlane.f32.xlu0 %v1019_v60 }
 0x2fe   : > { %v1021_v3 = vpop.xlane.xlu0 %1020 }
 0x2ff   : > { %6043 = vrcp.f32 %v1021_v3 }
 0x309   : > { %v6044_v4 = vpop.eup %6043 }
 0x30a   : > { %v1023_v5 = vmul.f32 %v6044_v4, %v6042_v59  ;;  %v5441_v59 = vld [vmem:[%s7193_s25 + $0x2] ss:$0 sm:$0xff] }
 0x30c   : > { %5710 = vmatmul.mubr.msk.f32.vlgmr.msra.gmra.mrb[4].mxu0 %vm935_vm10, %v1023_v5 }
 0x30d   : > { %5718 = vmatpush3.xpose.msk.msra.mxu0 %vm703_vm0, %v1099_v6  ;;  %5719 = vmatprep.mubr.msk.f32.mxu0 %vm6088_vm1, %v6087_v2 }
 0x30e   : > { %5727 = vmatprep.subr.mxu0 %v6087_v2 }
 0x310   : > { %5720 = vmatmul.mubr.msk.f32.vlgmr.msra.gmra.mrb[6].mxu0 %vm703_vm0, %v6322_v42 }
 0x311   : > { %5729 = vmatprep.mubr.msk.f32.mxu0 %vm6088_vm1, %v6087_v2 }
 0x3df   : > { %v1093_v9 = vpop.f32.mrb[4].mxu0 }
 0x3e0   : > { %v5711_v10 = vpop.f32.mrb[5].mxu0 }
 0x3e3   : > { %v1253_v13 = vpop.f32.mrb[6].mxu0 }
 0x3e4   : > { %v1254_v14 = vadd.f32 %v5430_v11, %v1253_v13  ;;  %v5721_v15 = vpop.f32.mrb[7].mxu0  ;;  %v5447_v11 = vld [vmem:[%s7193_s25 + $0xa] ss:$0 sm:$0xff] }
 0x3e6   : > { %5728 = vmatpush3.xpose.msk.msra.mxu0 %vm935_vm10, %v1254_v14  ;;  %v2041_v14 = vld [vmem:[%s7194_s23 + $0x10] sm:$0xff] }
 0x3e7   : > { %5737 = vmatprep.subr.mxu0 %v6087_v2 }
 0x3e9   : > { %5730 = vmatmul.mubr.msk.f32.vlgmr.msra.gmra.mrb[8].mxu0 %vm935_vm10, %v1176_v16 }
 0x3ea   : > { %5739 = vmatprep.mubr.msk.f32.mxu0 %vm6088_vm1, %v6087_v2  ;;  %5738 = vmatpush3.msra.mxu0 %v1496_v40 }
 0x3eb   : > { %5747 = vmatprep.subr.mxu0 %v6087_v2 }
 0x4bc   : > { %v1407_v19 = vpop.f32.mrb[8].mxu0 }
 0x4bd   : > { %v1411_v20 = vmul.f32 0.35355338, %v1407_v19  ;;  %v5731_v28 = vpop.f32.mrb[9].mxu0  ;;  %v2116_v19 = vld [vmem:[%s7189_s2 + $0x18] sm:$0xff] }
 0x4bf   : > { %v1412_v29 = vsel %vm935_vm10, %v1411_v20, -inf }
 0x4c0   : > { %1413 = vmax.xlane.f32.xlu1 %v1412_v29 }
 0x54d   : > { %v1414_v30 = vpop.xlane.xlu1 %1413 }
 0x54e   : > { %v1415_v32 = vsub.f32 %v1411_v20, %v1414_v30  ;;  %v2117_v20 = vld [vmem:[%s7189_s2 + $0x38] sm:$0xff] }
 0x550   : > { %v1416_v33 = vmul.f32 1.442695, %v1415_v32 }
 0x552   : > { %6045 = vpow2.f32 %v1416_v33 }
 0x55c   : > { %v6046_v34 = vpop.eup %6045 }
 0x55d   : > { %v1418_v35 = vsel %vm935_vm10, %v6046_v34, 0.0 }
 0x55e   : > { %1419 = vadd.xlane.f32.xlu1 %v1418_v35 }
 0x5eb   : > { %v1420_v41 = vpop.xlane.xlu1 %1419 }
 0x5ec   : > { %6047 = vrcp.f32 %v1420_v41 }
 0x5f6   : > { %v6048_v43 = vpop.eup %6047 }
 0x5f7   : > { %v1422_v44 = vmul.f32 %v6048_v43, %v6046_v34  ;;  %v2118_v43 = vld [vmem:[%s7189_s2 + $0x58] sm:$0xff] }
 0x5f9   : > { %5735 = vmatmul.mubr.msk.f32.vlgmr.msra.gmra.mrb[8].mxu1 %vm935_vm10, %v1422_v44 }
 0x5fa   : > { %5743 = vmatpush3.msra.mxu1 %v1097_v45  ;;  %5744 = vmatprep.mubr.msk.f32.mxu1 %vm6088_vm1, %v6087_v2 }
 0x5fb   : > { %5752 = vmatprep.subr.mxu1 %v6087_v2 }
 0x5fd   : > { %5745 = vmatmul.mubr.msk.f32.vlgmr.msra.gmra.mrb[10].mxu1 %vm935_vm10, %v1093_v9 }
 0x5fe   : > { %5754 = vmatprep.mubr.msk.f32.mxu1 %vm6088_vm1, %v6087_v2 }
 0x601   : > { %5753 = vmatpush3.xpose.msk.msra.mxu1 %vm703_vm0, %v1644_v46 }
 0x602   : > { %5762 = vmatprep.subr.mxu1 %v6087_v2 }
 0x604   : > { %5755 = vmatmul.mubr.msk.f32.vlgmr.msra.gmra.mrb[12].mxu1 %vm703_vm0, %v6322_v42 }
 0x605   : > { %5764 = vmatprep.mubr.msk.f32.mxu1 %vm6088_vm1, %v6087_v2 }
 0x6cc   : > { %v1492_v48 = vpop.f32.mrb[8].mxu1 }
 0x6cd   : > { %v5736_v49 = vpop.f32.mrb[9].mxu1  ;;  %5740 = vmatmul.mubr.msk.f32.vlgmr.msra.gmra.mrb[10].mxu0 %vm935_vm10, %v1492_v48 }
 0x6ce   : > { %5748 = vmatpush3.xpose.msk.msra.mxu0 %vm703_vm0, %v1643_v47  ;;  %5749 = vmatprep.mubr.msk.f32.mxu0 %vm6088_vm1, %v6087_v2 }
 0x6cf   : > { %5757 = vmatprep.subr.mxu0 %v6087_v2 }
 0x6d0   : > { %v1639_v50 = vpop.f32.mrb[10].mxu1 }
 0x6d1   : > { %v5746_v51 = vpop.f32.mrb[11].mxu1  ;;  %5750 = vmatmul.mubr.msk.f32.vlgmr.msra.gmra.mrb[12].mxu0 %vm703_vm0, %v6322_v42 }
 0x6d2   : > { %5759 = vmatprep.mubr.msk.f32.mxu0 %vm6088_vm1, %v6087_v2  ;;  %5758 = vmatpush3.xpose.msk.msra.mxu0 %vm703_vm0, %v1645_v63  ;;  %v5467_v63 = vld [vmem:[%s7195_s5] ss:$0 sm:$0xff]  ;;  %s5414_s5 = sshll.u32 %s7207_s22, 3 }
 0x6d3   : > { %5767 = vmatprep.subr.mxu0 %v6087_v2  ;;  %s607_s21 = scalar_lea.vmem %s7204_s0, %s5414_s5 }
 0x6d5   : > { %5760 = vmatmul.mubr.msk.f32.vlgmr.msra.gmra.mrb[14].mxu0 %vm703_vm0, %v6322_v42 }
 0x6d6   : > { %5769 = vmatprep.mubr.msk.f32.mxu0 %vm6088_vm1, %v6087_v2 }
 0x6d7   : > { %v1798_v52 = vpop.f32.mrb[12].mxu1 }
 0x6d8   : > { %v5756_v54 = vpop.f32.mrb[13].mxu1  ;;  %v1799_v55 = vadd.f32 %v5444_v53, %v1798_v52 }
 0x6da   : > { %5763 = vmatpush3.xpose.msk.msra.mxu1 %vm935_vm10, %v1799_v55 }
 0x6db   : > { %5772 = vmatprep.subr.mxu1 %v6087_v2 }
 0x7a0   : > { %v1566_v56 = vpop.f32.mrb[10].mxu0 }
 0x7a1   : > { %v1640_v57 = vadd.f32 %v1639_v50, %v1566_v56  ;;  %v5741_v58 = vpop.f32.mrb[11].mxu0  ;;  %v2514_v56 = vld [vmem:[%s7194_s23 + $0x18] sm:$0xff] }
 0x7a4   : > { %v1720_v60 = vpop.f32.mrb[12].mxu0 }
 0x7a5   : > { %v1721_v61 = vadd.f32 %v5441_v59, %v1720_v60  ;;  %v5751_v62 = vpop.f32.mrb[13].mxu0 }
 0x7a7   : > { %5765 = vmatmul.mubr.msk.f32.vlgmr.msra.gmra.mrb[14].mxu1 %vm935_vm10, %v1721_v61 }
 0x7a8   : > { %5774 = vmatprep.mubr.msk.f32.mxu1 %vm6088_vm1, %v6087_v2  ;;  %v1876_v10 = vpop.f32.mrb[14].mxu0  ;;  %5773 = vmatpush3.msra.mxu1 %v2041_v14 }
 0x7a9   : > { %v5761_v12 = vpop.f32.mrb[15].mxu0  ;;  %v1877_v13 = vadd.f32 %v5447_v11, %v1876_v10  ;;  %5782 = vmatprep.subr.mxu1 %v6087_v2 }
 0x7ab   : > { %5768 = vmatpush3.msra.mxu0 %v1877_v13 }
 0x7ac   : > { %5777 = vmatprep.subr.mxu0 %v6087_v2 }
 0x87a   : > { %v1952_v0 = vpop.f32.mrb[14].mxu1 }
 0x87b   : > { %v1956_v1 = vmul.f32 0.35355338, %v1952_v0  ;;  %v5766_v3 = vpop.f32.mrb[15].mxu1 }
 0x87d   : > { %v1957_v4 = vsel %vm935_vm10, %v1956_v1, -inf }
 0x87e   : > { %1958 = vmax.xlane.f32.xlu0 %v1957_v4 }
 0x90b   : > { %v1959_v5 = vpop.xlane.xlu0 %1958 }
 0x90c   : > { %v1960_v6 = vsub.f32 %v1956_v1, %v1959_v5 }
 0x90e   : > { %v1961_v7 = vmul.f32 1.442695, %v1960_v6 }
 0x910   : > { %6049 = vpow2.f32 %v1961_v7 }
 0x91a   : > { %v6050_v8 = vpop.eup %6049 }
 0x91b   : > { %v1963_v9 = vsel %vm935_vm10, %v6050_v8, 0.0 }
 0x91c   : > { %1964 = vadd.xlane.f32.xlu1 %v1963_v9 }
 0x9a9   : > { %v1965_v15 = vpop.xlane.xlu1 %1964 }
 0x9aa   : > { %6051 = vrcp.f32 %v1965_v15 }
 0x9b4   : > { %v6052_v16 = vpop.eup %6051 }
 0x9b5   : > { %v1967_v17 = vmul.f32 %v6052_v16, %v6050_v8 }
 0x9b7   : > { %5770 = vmatmul.mubr.msk.f32.vlgmr.msra.gmra.mrb[16].mxu0 %vm935_vm10, %v1967_v17 }
 0x9b8   : > { %5779 = vmatprep.mubr.msk.f32.mxu0 %vm6088_vm1, %v6087_v2  ;;  %5778 = vmatpush3.xpose.msk.msra.mxu0 %vm703_vm0, %v2116_v19 }
 0x9b9   : > { %5787 = vmatprep.subr.mxu0 %v6087_v2 }
 0x9bb   : > { %5780 = vmatmul.mubr.msk.f32.vlgmr.msra.gmra.mrb[18].mxu0 %vm703_vm0, %v6322_v42 }
 0x9bc   : > { %5789 = vmatprep.mubr.msk.f32.mxu0 %vm6088_vm1, %v6087_v2  ;;  %5788 = vmatpush3.xpose.msk.msra.mxu0 %vm703_vm0, %v2118_v43 }
 0x9bd   : > { %5797 = vmatprep.subr.mxu0 %v6087_v2 }
 0x9bf   : > { %5790 = vmatmul.mubr.msk.f32.vlgmr.msra.gmra.mrb[20].mxu0 %vm703_vm0, %v6322_v42 }
 0x9c0   : > { %5799 = vmatprep.mubr.msk.f32.mxu0 %vm6088_vm1, %v6087_v2 }
 0xa8a   : > { %v2037_v28 = vpop.f32.mrb[16].mxu0 }
 0xa8b   : > { %v5771_v29 = vpop.f32.mrb[17].mxu0  ;;  %5775 = vmatmul.mubr.msk.f32.vlgmr.msra.gmra.mrb[16].mxu1 %vm935_vm10, %v2037_v28 }
 0xa8c   : > { %5783 = vmatpush3.xpose.msk.msra.mxu1 %vm703_vm0, %v2117_v20  ;;  %5784 = vmatprep.mubr.msk.f32.mxu1 %vm6088_vm1, %v6087_v2 }
 0xa8d   : > { %5792 = vmatprep.subr.mxu1 %v6087_v2 }
 0xa8e   : > { %v2193_v30 = vpop.f32.mrb[18].mxu0 }
 0xa8f   : > { %5785 = vmatmul.mubr.msk.f32.vlgmr.msra.gmra.mrb[18].mxu1 %vm703_vm0, %v6322_v42  ;;  %v5781_v32 = vpop.f32.mrb[19].mxu0  ;;  %v2194_v41 = vadd.f32 %v5454_v37, %v2193_v30  ;;  %v5460_v42 = vld [vmem:[%s7193_s25 + $0xb] ss:$0 sm:$0xff] }
 0xa90   : > { %5794 = vmatprep.mubr.msk.f32.mxu1 %vm6088_vm1, %v6087_v2 }
 0xa92   : > { %v2349_v53 = vpop.f32.mrb[20].mxu0 }
 0xa93   : > { %v5791_v54 = vpop.f32.mrb[21].mxu0  ;;  %v2350_v55 = vadd.f32 %v5460_v42, %v2349_v53 }
 0xa95   : > { %5798 = vmatpush3.msra.mxu0 %v2350_v55 }
 0xa96   : > { %5807 = vmatprep.subr.mxu0 %v6087_v2 }
 0xb5e   : > { %v2111_v33 = vpop.f32.mrb[16].mxu1 }
 0xb5f   : > { %v2115_v34 = vadd.f32 %v2111_v33, %v1640_v57  ;;  %v5776_v35 = vpop.f32.mrb[17].mxu1 }
 0xb62   : > { %v2271_v38 = vpop.f32.mrb[18].mxu1 }
 0xb63   : > { %v2272_v39 = vadd.f32 %v5457_v36, %v2271_v38  ;;  %v5786_v40 = vpop.f32.mrb[19].mxu1 }
 0xb65   : > { %5793 = vmatpush3.xpose.msk.msra.mxu1 %vm935_vm10, %v2272_v39 }
 0xb66   : > { %5802 = vmatprep.subr.mxu1 %v6087_v2 }
 0xb68   : > { %5795 = vmatmul.mubr.msk.f32.vlgmr.msra.gmra.mrb[20].mxu1 %vm935_vm10, %v2194_v41 }
 0xb69   : > { %5804 = vmatprep.mubr.msk.f32.mxu1 %vm6088_vm1, %v6087_v2  ;;  %5803 = vmatpush3.msra.mxu1 %v2514_v56 }
 0xc3b   : > { %v2425_v44 = vpop.f32.mrb[20].mxu1 }
 0xc3c   : > { %v2429_v45 = vmul.f32 0.35355338, %v2425_v44  ;;  %v5796_v46 = vpop.f32.mrb[21].mxu1 }
 0xc3e   : > { %v2430_v47 = vsel %vm935_vm10, %v2429_v45, -inf }
 0xc3f   : > { %2431 = vmax.xlane.f32.xlu0 %v2430_v47 }
 0xccc   : > { %v2432_v48 = vpop.xlane.xlu0 %2431 }
 0xccd   : > { %v2433_v49 = vsub.f32 %v2429_v45, %v2432_v48 }
 0xccf   : > { %v2434_v50 = vmul.f32 1.442695, %v2433_v49 }
 0xcd1   : > { %6053 = vpow2.f32 %v2434_v50 }
 0xcdb   : > { %v6054_v51 = vpop.eup %6053 }
 0xcdc   : > { %v2436_v52 = vsel %vm935_vm10, %v6054_v51, 0.0 }
 0xcdd   : > { %2437 = vadd.xlane.f32.xlu1 %v2436_v52 }
 0xd6a   : > { %v2438_v57 = vpop.xlane.xlu1 %2437 }
 0xd6b   : > { %6055 = vrcp.f32 %v2438_v57 }
 0xd75   : > { %v6056_v58 = vpop.eup %6055 }
 0xd76   : > { %v2440_v59 = vmul.f32 %v6056_v58, %v6054_v51 }
 0xd78   : > { %5800 = vmatmul.mubr.msk.f32.vlgmr.msra.gmra.mrb[22].mxu0 %vm935_vm10, %v2440_v59 }
 0xd79   : > { %5809 = vmatprep.mubr.msk.f32.mxu0 %vm6088_vm1, %v6087_v2 }
 0xe4b   : > { %v2510_v60 = vpop.f32.mrb[22].mxu0 }
 0xe4c   : > { %v5801_v61 = vpop.f32.mrb[23].mxu0  ;;  %5805 = vmatmul.mubr.msk.f32.vlgmr.msra.gmra.mrb[22].mxu1 %vm935_vm10, %v2510_v60 }
 0xf1f   : > { %v2584_v62 = vpop.f32.mrb[22].mxu1 }
 0xf20   : > { %v2588_v0 = vadd.f32 %v2584_v62, %v2115_v34  ;;  %v5806_v1 = vpop.f32.mrb[23].mxu1 }
 0xf22   : > { %v2596_v3 = vadd.f32 %v5467_v63, %v2588_v0 }
 0xf24   : > { %v2600_v4 = vrot.slane %v2596_v3, 1  ;;  %v2601_v5 = vrot.slane %v2596_v3, 2  ;;  %v2602_v6 = vrot.slane %v2596_v3, 3  ;;  %v2603_v7 = vrot.slane %v2596_v3, 4 }
 0xf25   : > { %v2604_v8 = vrot.slane %v2596_v3, 5  ;;  %v2605_v9 = vrot.slane %v2596_v3, 6  ;;  %v2606_v10 = vrot.slane %v2596_v3, 7  ;;  %v2615_v15 = vadd.f32 %v2596_v3, %v6289_v24 }
 0xf26   : > { %v2616_v11 = vadd.f32 %v2600_v4, %v6277_v21  ;;  %v2617_v12 = vadd.f32 %v2601_v5, %v6281_v22  ;;  %v2618_v13 = vadd.f32 %v2602_v6, %v6285_v23  ;;  %v2619_v14 = vadd.f32 %v2603_v7, %v6293_v25 }
 0xf27   : > { %v2620_v16 = vadd.f32 %v2604_v8, %v6297_v26  ;;  %v2621_v20 = vadd.f32 %v2605_v9, %v6301_v27  ;;  %v2622_v28 = vadd.f32 %v2606_v10, %v6308_v31 }
 0xf28   : > { %v2631_v17 = vrot.slane %v2616_v11, 7  ;;  %v2633_v19 = vrot.slane %v2617_v12, 6  ;;  %v2635_v30 = vrot.slane %v2618_v13, 5  ;;  %v2637_v22 = vrot.slane %v2619_v14, 4 }
 0xf29   : > { %v2639_v32 = vrot.slane %v2620_v16, 3  ;;  %v2641_v24 = vrot.slane %v2621_v20, 2  ;;  %v2643_v33 = vrot.slane %v2622_v28, 1 }
 0xf2a   : > { %v2632_v29 = vsel %vm683_vm3, %v2631_v17, %v2615_v15  ;;  %v620_v17 = vld [vmem:[%s7197_s3 + $0x8] sm:$0x1] }
 0xf2b   : > { %v2634_v21 = vsel %vm686_vm4, %v2633_v19, %v2632_v29  ;;  %v621_v19 = vld [vmem:[%s7197_s3 + $0xa] sm:$0x1]  ;;  %v646_v29 = vld [vmem:[%s7197_s3 + $0x1] sm:$0x1] }
 0xf2c   : > { %v2636_v23 = vsel %vm689_vm5, %v2635_v30, %v2634_v21  ;;  %v647_v30 = vld [vmem:[%s7197_s3 + $0x3] sm:$0x1]  ;;  %v648_v21 = vld [vmem:[%s7197_s3 + $0x5] sm:$0x1] }
 0xf2d   : > { %v2638_v25 = vsel %vm692_vm6, %v2637_v22, %v2636_v23  ;;  %v649_v22 = vld [vmem:[%s7197_s3 + $0x7] sm:$0x1]  ;;  %v650_v23 = vld [vmem:[%s7197_s3 + $0x9] sm:$0x1] }
 0xf2e   : > { %v2640_v26 = vsel %vm695_vm7, %v2639_v32, %v2638_v25  ;;  %v651_v32 = vld [vmem:[%s7197_s3 + $0xb] sm:$0x1] }
 0xf2f   : > { %v2642_v34 = vsel %vm698_vm8, %v2641_v24, %v2640_v26 }
 0xf30   : > { %v2644_v27 = vsel %vm701_vm9, %v2643_v33, %v2642_v34  ;;  %v652_v33 = vld [vmem:[%s7197_s3 + $0xd] sm:$0x1]  ;;  %v653_v34 = vld [vmem:[%s7197_s3 + $0xf] sm:$0x1] }
 0xf31   : > { %v2646_v31 = vsel %vm703_vm0, %v2644_v27, 0.0 }
 0xf32   : > { %2647 = vadd.xlane.f32.xlu0 %v2646_v31  ;;  %v660_v31 = vsel %vm6265_vm2, %v650_v23, %v620_v17 }
 0xfbf   : > { %v2648_v35 = vpop.xlane.xlu0 %2647 }
 0xfc0   : > { %v2650_v36 = vmul.f32 0.03125, %v2648_v35  ;;  %v661_v35 = vsel %vm6265_vm2, %v651_v32, %v621_v19 }
 0xfc2   : > { %v2652_v37 = vrot.slane %v2650_v36, 1  ;;  %v2653_v38 = vrot.slane %v2650_v36, 2  ;;  %v2654_v39 = vrot.slane %v2650_v36, 3  ;;  %v2655_v40 = vrot.slane %v2650_v36, 4 }
 0xfc3   : > { %v2656_v41 = vrot.slane %v2650_v36, 5  ;;  %v2657_v43 = vrot.slane %v2650_v36, 6  ;;  %v2658_v44 = vrot.slane %v2650_v36, 7  ;;  %v6546_v45 = vsub.f32 %v2615_v15, %v2650_v36  ;;  %v618_v15 = vld [vmem:[%s7197_s3 + $0x4] sm:$0x1] }
 0xfc4   : > { %v6548_v46 = vsub.f32 %v2616_v11, %v2652_v37  ;;  %v6550_v47 = vsub.f32 %v2617_v12, %v2653_v38  ;;  %v6552_v48 = vsub.f32 %v2618_v13, %v2654_v39  ;;  %v6554_v49 = vsub.f32 %v2619_v14, %v2655_v40  ;;  %v2765_v12 = vld [vmem:[%s7159_s6 + $0x20] sm:$0xff] }
 0xfc5   : > { %v6556_v50 = vsub.f32 %v2620_v16, %v2656_v41  ;;  %v6558_v51 = vsub.f32 %v2621_v20, %v2657_v43  ;;  %v6560_v52 = vsub.f32 %v2622_v28, %v2658_v44  ;;  %v2675_v56 = vmul.f32 %v6546_v45, %v6546_v45  ;;  %v616_v13 = vld [vmem:[%s7196_s1] sm:$0x1]  ;;  %v617_v14 = vld [vmem:[%s7197_s3 + $0x2] sm:$0x1]  ;;  %5812 = vmatprep.subr.msk.mxu1 %vm703_vm0, %v2765_v12  ;;  %v619_v16 = vld [vmem:[%s7197_s3 + $0x6] sm:$0x1] }
 0xfc6   : > { %v2676_v53 = vmul.f32 %v6548_v46, %v6548_v46  ;;  %v2677_v42 = vmul.f32 %v6550_v47, %v6550_v47  ;;  %v2678_v54 = vmul.f32 %v6552_v48, %v6552_v48  ;;  %v2679_v55 = vmul.f32 %v6554_v49, %v6554_v49  ;;  %5813 = vmatpush3.xpose.msk.msra.mxu1 %vm703_vm0, %v2765_v12  ;;  %v622_v20 = vld [vmem:[%s7197_s3 + $0xc] sm:$0x1]  ;;  %v623_v28 = vld [vmem:[%s7197_s3 + $0xe] sm:$0x1]  ;;  %v2764_v37 = vld [vmem:[%s7159_s6] sm:$0xff] }
 0xfc7   : > { %v2680_v57 = vmul.f32 %v6556_v50, %v6556_v50  ;;  %v2681_v60 = vmul.f32 %v6558_v51, %v6558_v51  ;;  %v2682_v61 = vmul.f32 %v6560_v52, %v6560_v52  ;;  %v656_v25 = vsel %vm6265_vm2, %v646_v29, %v616_v13  ;;  %v624_v43 = vld [vmem:[%s7197_s3 + $0x10] sm:$0x1]  ;;  %v625_v44 = vld [vmem:[%s7197_s3 + $0x12] sm:$0x1]  ;;  %5808 = vmatpush3.xpose.msk.msra.mxu0 %vm703_vm0, %v2764_v37 }
 0xfc8   : > { %v2691_v58 = vrot.slane %v2676_v53, 7  ;;  %v2693_v59 = vrot.slane %v2677_v42, 6  ;;  %v2695_v63 = vrot.slane %v2678_v54, 5  ;;  %v2697_v1 = vrot.slane %v2679_v55, 4  ;;  %v654_v55 = vld [vmem:[%s7197_s3 + $0x11] sm:$0x1]  ;;  %5973 = vmatprep.subr.bf16.mxu1 %v6089_v18 }
 0xfc9   : > { %v2699_v4 = vrot.slane %v2680_v57, 3  ;;  %v2701_v6 = vrot.slane %v2681_v60, 2  ;;  %v2703_v8 = vrot.slane %v2682_v61, 1  ;;  %v657_v24 = vsel %vm6265_vm2, %v647_v30, %v617_v14 }
 0xfca   : > { %v2692_v62 = vsel %vm683_vm3, %v2691_v58, %v2675_v56  ;;  %v658_v26 = vsel %vm6265_vm2, %v648_v21, %v618_v15  ;;  %v659_v27 = vsel %vm6265_vm2, %v649_v22, %v619_v16  ;;  %v2884_v36 = vrot.slane %v657_v24, 7  ;;  %v655_v58 = vld [vmem:[%s7197_s3 + $0x13] sm:$0x1] }
 0xfcb   : > { %v2694_v0 = vsel %vm686_vm4, %v2693_v59, %v2692_v62  ;;  %v662_v38 = vsel %vm6265_vm2, %v652_v33, %v622_v20  ;;  %v663_v39 = vsel %vm6265_vm2, %v653_v34, %v623_v28  ;;  %v2886_v40 = vrot.slane %v658_v26, 6 }
 0xfcc   : > { %v2696_v3 = vsel %vm689_vm5, %v2695_v63, %v2694_v0  ;;  %v2888_v41 = vrot.slane %v659_v27, 5  ;;  %v2885_v53 = vsel %vm683_vm3, %v2884_v36, %v656_v25  ;;  %v2890_v42 = vrot.slane %v660_v31, 4 }
 0xfcd   : > { %v2698_v5 = vsel %vm692_vm6, %v2697_v1, %v2696_v3  ;;  %v2892_v54 = vrot.slane %v661_v35, 3  ;;  %v2887_v56 = vsel %vm686_vm4, %v2886_v40, %v2885_v53  ;;  %v2894_v57 = vrot.slane %v662_v38, 2 }
 0xfce   : > { %v2700_v7 = vsel %vm695_vm7, %v2699_v4, %v2698_v5  ;;  %v2889_v59 = vsel %vm689_vm5, %v2888_v41, %v2887_v56  ;;  %v2896_v60 = vrot.slane %v663_v39, 1  ;;  %v664_v61 = vsel %vm6265_vm2, %v654_v55, %v624_v43 }
 0xfcf   : > { %v2702_v9 = vsel %vm698_vm8, %v2701_v6, %v2700_v7  ;;  %v665_v62 = vsel %vm6265_vm2, %v655_v58, %v625_v44  ;;  %v2891_v63 = vsel %vm692_vm6, %v2890_v42, %v2889_v59  ;;  %v5473_v58 = vld [vmem:[%s7160_s7 + $0x4] ss:$0 sm:$0xff]  ;;  %vm5093_vm2 = vcmask 523264  }
 0xfd0   : > { %v2704_v10 = vsel %vm701_vm9, %v2703_v8, %v2702_v9  ;;  %v2898_v0 = vrot.slane %v665_v62, 7  ;;  %v2893_v1 = vsel %vm695_vm7, %v2892_v54, %v2891_v63 }
 0xfd1   : > { %v2706_v11 = vsel %vm703_vm0, %v2704_v10, 0.0  ;;  %v2895_v3 = vsel %vm698_vm8, %v2894_v57, %v2893_v1  ;;  %v5468_v10 = vld [vmem:[%s7167_s14] ss:$0 sm:$0xff] }
 0xfd2   : > { %2707 = vadd.xlane.f32.xlu1 %v2706_v11  ;;  %v6682_v4 = vsel %vm683_vm3, %v2898_v0, %v664_v61  ;;  %v6685_v5 = vsel %vm701_vm9, %v2896_v60, %v2895_v3  ;;  %v5470_v1 = vld [vmem:[%s7160_s7] ss:$0 sm:$0xff] }
 0xfd3   : > { %5814 = vmatprep.mubr.msk.f32.mxu1 %vm703_vm0, %v6685_v5 }
 0xfd4   : > { %5815 = vmatmul.mubr.msk.f32.vlgmr.msra.gmra.mrb[24].mxu1 %vm703_vm0, %v6682_v4 }
 0xfd5   : > { %5826 = vmatprep.mubr.msk.f32.mxu1 %vm6088_vm1, %v6087_v2 }
0x105f   : > { %v2708_v6 = vpop.xlane.xlu1 %2707 }
0x1060   : > { %v2709_v7 = vmul.f32 0.03125, %v2708_v6 }
0x1062   : > { %v2710_v8 = vadd.f32 1e-05, %v2709_v7 }
0x1064   : > { %6057 = vrsqrt.f32 %v2710_v8  ;;  %v2766_v8 = vld [vmem:[%s7159_s6 + $0x40] sm:$0xff] }
0x1065   : > { %5817 = vmatprep.subr.msk.mxu0 %vm703_vm0, %v2766_v8 }
0x106e   : > { %v6058_v9 = vpop.eup %6057 }
0x106f   : > { %v2713_v11 = vrot.slane %v6058_v9, 1  ;;  %v2714_v12 = vrot.slane %v6058_v9, 2  ;;  %v2715_v13 = vrot.slane %v6058_v9, 3  ;;  %v2716_v14 = vrot.slane %v6058_v9, 4 }
0x1070   : > { %v2717_v15 = vrot.slane %v6058_v9, 5  ;;  %v2718_v16 = vrot.slane %v6058_v9, 6  ;;  %v2719_v17 = vrot.slane %v6058_v9, 7  ;;  %v2728_v19 = vmul.f32 %v6058_v9, %v6546_v45  ;;  %v5469_v45 = vld [vmem:[%s7168_s15] ss:$0 sm:$0xff] }
0x1071   : > { %v2729_v20 = vmul.f32 %v2713_v11, %v6548_v46  ;;  %v2730_v28 = vmul.f32 %v2714_v12, %v6550_v47  ;;  %v2731_v29 = vmul.f32 %v2715_v13, %v6552_v48  ;;  %v2732_v30 = vmul.f32 %v2716_v14, %v6554_v49 }
0x1072   : > { %v2733_v21 = vmul.f32 %v2717_v15, %v6556_v50  ;;  %v2734_v22 = vmul.f32 %v2718_v16, %v6558_v51  ;;  %v2735_v23 = vmul.f32 %v2719_v17, %v6560_v52  ;;  %v2742_v32 = vmul.f32 %v5468_v10, %v2728_v19 }
0x1073   : > { %v2743_v25 = vmul.f32 %v5468_v10, %v2729_v20  ;;  %v2744_v24 = vmul.f32 %v5468_v10, %v2730_v28  ;;  %v2745_v26 = vmul.f32 %v5468_v10, %v2731_v29  ;;  %v2746_v33 = vmul.f32 %v5468_v10, %v2732_v30  ;;  %v5477_v20 = vld [vmem:[%s7160_s7 + $0x8] ss:$0 sm:$0xff] }
0x1074   : > { %v2747_v46 = vmul.f32 %v5468_v10, %v2733_v21  ;;  %v2748_v47 = vmul.f32 %v5468_v10, %v2734_v22  ;;  %v2749_v48 = vmul.f32 %v5468_v10, %v2735_v23  ;;  %v6716_v52 = vadd.f32 %v5469_v45, %v2742_v32  ;;  %v3236_v21 = vld [vmem:[%s7159_s6 + $0x28] sm:$0xff] }
0x1075   : > { %v6708_v34 = vadd.f32 %v5469_v45, %v2743_v25  ;;  %v6710_v49 = vadd.f32 %v5469_v45, %v2744_v24  ;;  %v6712_v50 = vadd.f32 %v5469_v45, %v2745_v26  ;;  %v6714_v51 = vadd.f32 %v5469_v45, %v2746_v33  ;;  %v3235_v26 = vld [vmem:[%s7159_s6 + $0x8] sm:$0xff]  ;;  %v5489_v33 = vld [vmem:[%s7160_s7 + $0x5] ss:$0 sm:$0xff] }
0x1076   : > { %v6718_v27 = vadd.f32 %v5469_v45, %v2747_v46  ;;  %v6722_v36 = vadd.f32 %v5469_v45, %v2748_v47  ;;  %v6724_v37 = vadd.f32 %v5469_v45, %v2749_v48 }
0x1077   : > { %v2780_v31 = vrot.slane %v6708_v34, 7  ;;  %v2782_v35 = vrot.slane %v6710_v49, 6  ;;  %v2784_v39 = vrot.slane %v6712_v50, 5  ;;  %v2786_v41 = vrot.slane %v6714_v51, 4 }
0x1078   : > { %v2788_v44 = vrot.slane %v6718_v27, 3  ;;  %v2790_v42 = vrot.slane %v6722_v36, 2  ;;  %v2792_v55 = vrot.slane %v6724_v37, 1 }
0x1079   : > { %v2781_v38 = vsel %vm683_vm3, %v2780_v31, %v6716_v52 }
0x107a   : > { %v2783_v40 = vsel %vm686_vm4, %v2782_v35, %v2781_v38 }
0x107b   : > { %v2785_v43 = vsel %vm689_vm5, %v2784_v39, %v2783_v40  ;;  %v5486_v39 = vld [vmem:[%s7160_s7 + $0x1] ss:$0 sm:$0xff] }
0x107c   : > { %v2787_v53 = vsel %vm692_vm6, %v2786_v41, %v2785_v43 }
0x107d   : > { %v2789_v54 = vsel %vm695_vm7, %v2788_v44, %v2787_v53  ;;  %v3234_v44 = vld [vmem:[%s7161_s8] sm:$0xff]  ;;  %v3237_v53 = vld [vmem:[%s7159_s6 + $0x48] sm:$0xff] }
0x107e   : > { %v2791_v56 = vsel %vm698_vm8, %v2790_v42, %v2789_v54 }
0x107f   : > { %v6739_v57 = vsel %vm701_vm9, %v2792_v55, %v2791_v56 }
0x1080   : > { %5810 = vmatmul.mubr.msk.f32.vlgmr.msra.gmra.mrb[24].mxu0 %vm703_vm0, %v6739_v57 }
0x1081   : > { %5819 = vmatprep.mubr.msk.f32.mxu0 %vm703_vm0, %v6685_v5  ;;  %5818 = vmatpush3.xpose.msk.msra.mxu0 %vm703_vm0, %v2766_v8 }
0x1082   : > { %5977 = vmatprep.subr.bf16.mxu0 %v6089_v18 }
0x1084   : > { %5820 = vmatmul.mubr.msk.f32.vlgmr.msra.gmra.mrb[26].mxu0 %vm703_vm0, %v6682_v4 }
0x1085   : > { %5833 = vmatprep.mubr.msk.f32.mxu0 %vm6088_vm1, %v6087_v2 }
0x10a7   : > { %v5816_v59 = vpop.f32.mrb[24].mxu1 }
0x10a8   : > { %v2979_v60 = vadd.f32 %v5816_v59, %v5473_v58  ;;  %v2973_v61 = vpop.f32.mrb[25].mxu1 }
0x10a9   : > { %v2974_v62 = vadd.f32 %v5473_v58, %v2973_v61 }
0x10ab   : > { %v5974_v0 = vpack.c.bf16 %v2979_v60, %v2974_v62 }
0x10ad   : > { %5976 = vmatpush3.bf16.xpose.msk.msra.mxu1 %vm6750_vm11, %v5974_v0 }
0x10ae   : > { %5841 = vmatprep.subr.msk.mxu1 %vm703_vm0, %v3236_v21 }
0x1153   : > { %v2865_v3 = vpop.f32.mrb[24].mxu0 }
0x1154   : > { %v2866_v6 = vadd.f32 %v5470_v1, %v2865_v3  ;;  %v5811_v7 = vpop.f32.mrb[25].mxu0 }
0x1156   : > { %5827 = vmatmul.mubr.msk.f32.vlgmr.msra.gmra.mrb[26].mxu1 %vm935_vm10, %v2866_v6  ;;  %v5493_v6 = vld [vmem:[%s7160_s7 + $0x9] ss:$0 sm:$0xff] }
0x1157   : > { %5843 = vmatprep.mubr.msk.f32.mxu1 %vm703_vm0, %v6685_v5  ;;  %v5821_v13 = vpop.f32.mrb[26].mxu0  ;;  %5842 = vmatpush3.xpose.msk.msra.mxu1 %vm703_vm0, %v3236_v21 }
0x1158   : > { %v3062_v28 = vadd.f32 %v5821_v13, %v5477_v20  ;;  %v3056_v29 = vpop.f32.mrb[27].mxu0  ;;  %5981 = vmatprep.subr.bf16.mxu1 %v6089_v18 }
0x1159   : > { %v3057_v30 = vadd.f32 %v5477_v20, %v3056_v29 }
0x115a   : > { %5844 = vmatmul.mubr.msk.f32.vlgmr.msra.gmra.mrb[28].mxu1 %vm703_vm0, %v6682_v4 }
0x115b   : > { %v5978_v22 = vpack.c.bf16 %v3062_v28, %v3057_v30  ;;  %5855 = vmatprep.mubr.msk.f32.mxu1 %vm6088_vm1, %v6087_v2  ;;  %v3796_v30 = vld [vmem:[%s7159_s6 + $0x10] sm:$0xff] }
0x115d   : > { %5980 = vmatpush3.bf16.msk.msra.mxu0 %vm6781_vm15, %v5978_v22 }
0x115e   : > { %5836 = vmatprep.subr.mxu0 %v6087_v2 }
0x1229   : > { %v3140_v9 = vpop.f32.mrb[26].mxu1 }
0x122a   : > { %v3144_v10 = vmul.f32 0.35355338, %v3140_v9  ;;  %v5828_v11 = vpop.f32.mrb[27].mxu1 }
0x122b   : > { %v3797_v11 = vld [vmem:[%s7159_s6 + $0x30] sm:$0xff] }
0x122c   : > { %v3146_v12 = vsel %vm3145_vm12, %v3144_v10, -inf }
0x122d   : > { %3147 = vmax.xlane.f32.xlu0 %v3146_v12  ;;  %v5845_v45 = vpop.f32.mrb[28].mxu1 }
0x122e   : > { %v3396_v46 = vadd.f32 %v5845_v45, %v5489_v33  ;;  %v3390_v47 = vpop.f32.mrb[29].mxu1 }
0x122f   : > { %v3391_v48 = vadd.f32 %v5489_v33, %v3390_v47  ;;  %v4285_v47 = vld [vmem:[%s7159_s6 + $0x18] sm:$0xff] }
0x1231   : > { %v5982_v31 = vpack.c.bf16 %v3396_v46, %v3391_v48  ;;  %v3798_v48 = vld [vmem:[%s7159_s6 + $0x50] sm:$0xff] }
0x1233   : > { %5984 = vmatpush3.bf16.xpose.msk.msra.mxu1 %vm6750_vm11, %v5982_v31 }
0x1234   : > { %5870 = vmatprep.subr.mxu1 %v6087_v2 }
0x12ba   : > { %v3148_v14 = vpop.xlane.xlu0 %3147 }
0x12bb   : > { %v3149_v15 = vsub.f32 %v3144_v10, %v3148_v14 }
0x12bd   : > { %v3150_v16 = vmul.f32 1.442695, %v3149_v15  ;;  %v3649_v15 = vld [vmem:[%s7161_s8 + $0x8] sm:$0xff] }
0x12bf   : > { %6059 = vpow2.f32 %v3150_v16 }
0x12c9   : > { %v6060_v17 = vpop.eup %6059 }
0x12ca   : > { %v3152_v19 = vsel %vm3145_vm12, %v6060_v17, 0.0 }
0x12cb   : > { %3153 = vadd.xlane.f32.xlu1 %v3152_v19 }
0x1358   : > { %v3154_v32 = vpop.xlane.xlu1 %3153 }
0x1359   : > { %6061 = vrcp.f32 %v3154_v32 }
0x1363   : > { %v6062_v25 = vpop.eup %6061 }
0x1364   : > { %v3156_v24 = vmul.f32 %v6062_v25, %v6060_v17  ;;  %v5507_v17 = vld [vmem:[%s7160_s7 + $0x6] ss:$0 sm:$0xff] }
0x1366   : > { %5834 = vmatmul.mubr.msk.f32.vlgmr.msra.gmra.mrb[28].mxu0 %vm3145_vm12, %v3156_v24 }
0x1367   : > { %5837 = vmatpush3.xpose.msk.msra.mxu0 %vm703_vm0, %v3235_v26  ;;  %5838 = vmatprep.mubr.msk.f32.mxu0 %vm6088_vm1, %v6087_v2  ;;  %v5504_v26 = vld [vmem:[%s7160_s7 + $0x2] ss:$0 sm:$0xff] }
0x1368   : > { %5846 = vmatprep.subr.msk.mxu0 %vm703_vm0, %v3237_v53 }
0x136a   : > { %5839 = vmatmul.mubr.msk.f32.vlgmr.msra.gmra.mrb[30].mxu0 %vm703_vm0, %v6739_v57 }
0x136b   : > { %5848 = vmatprep.mubr.msk.f32.mxu0 %vm703_vm0, %v6685_v5  ;;  %5847 = vmatpush3.xpose.msk.msra.mxu0 %vm703_vm0, %v3237_v53 }
0x136c   : > { %5985 = vmatprep.subr.bf16.mxu0 %v6089_v18 }
0x136e   : > { %5849 = vmatmul.mubr.msk.f32.vlgmr.msra.gmra.mrb[32].mxu0 %vm703_vm0, %v6682_v4 }
0x136f   : > { %5862 = vmatprep.mubr.msk.f32.mxu0 %vm6088_vm1, %v6087_v2 }
0x1439   : > { %v3230_v35 = vpop.f32.mrb[28].mxu0 }
0x143a   : > { %v5835_v38 = vpop.f32.mrb[29].mxu0 }
0x143d   : > { %v3312_v40 = vpop.f32.mrb[30].mxu0 }
0x143e   : > { %v3313_v41 = vadd.f32 %v5486_v39, %v3312_v40  ;;  %v5840_v43 = vpop.f32.mrb[31].mxu0 }
0x1440   : > { %5856 = vmatmul.mubr.msk.f32.vlgmr.msra.gmra.mrb[30].mxu1 %vm935_vm10, %v3313_v41 }
0x1441   : > { %5871 = vmatpush3.msra.mxu1 %v3234_v44  ;;  %5872 = vmatprep.mubr.msk.f32.mxu1 %vm6088_vm1, %v6087_v2  ;;  %v5850_v3 = vpop.f32.mrb[32].mxu0 }
0x1442   : > { %v3473_v7 = vpop.f32.mrb[33].mxu0  ;;  %v3479_v8 = vadd.f32 %v5850_v3, %v5493_v6  ;;  %5880 = vmatprep.subr.msk.mxu1 %vm703_vm0, %v3797_v11  ;;  %v4286_v3 = vld [vmem:[%s7159_s6 + $0x38] sm:$0xff] }
0x1443   : > { %v3474_v9 = vadd.f32 %v5493_v6, %v3473_v7 }
0x1444   : > { %5873 = vmatmul.mubr.msk.f32.vlgmr.msra.gmra.mrb[32].mxu1 %vm935_vm10, %v3230_v35 }
0x1445   : > { %5882 = vmatprep.mubr.msk.f32.mxu1 %vm703_vm0, %v6685_v5  ;;  %v5986_v10 = vpack.c.bf16 %v3479_v8, %v3474_v9  ;;  %v4287_v8 = vld [vmem:[%s7159_s6 + $0x58] sm:$0xff] }
0x1447   : > { %5988 = vmatpush3.bf16.msk.msra.mxu0 %vm6781_vm15, %v5986_v10 }
0x1448   : > { %5865 = vmatprep.subr.mxu0 %v6087_v2  ;;  %5881 = vmatpush3.xpose.msk.msra.mxu1 %vm703_vm0, %v3797_v11  ;;  %v5524_v11 = vld [vmem:[%s7160_s7 + $0x7] ss:$0 sm:$0xff] }
0x1449   : > { %5989 = vmatprep.subr.bf16.mxu1 %v6089_v18 }
0x144b   : > { %5883 = vmatmul.mubr.msk.f32.vlgmr.msra.gmra.mrb[34].mxu1 %vm703_vm0, %v6682_v4 }
0x144c   : > { %5894 = vmatprep.mubr.msk.f32.mxu1 %vm6088_vm1, %v6087_v2 }
0x1513   : > { %v3557_v42 = vpop.f32.mrb[30].mxu1 }
0x1514   : > { %v3561_v54 = vmul.f32 0.35355338, %v3557_v42  ;;  %v5857_v55 = vpop.f32.mrb[31].mxu1 }
0x1515   : > { %v5511_v55 = vld [vmem:[%s7160_s7 + $0xa] ss:$0 sm:$0xff] }
0x1516   : > { %v3562_v56 = vsel %vm3145_vm12, %v3561_v54, -inf }
0x1517   : > { %3563 = vmax.xlane.f32.xlu0 %v3562_v56  ;;  %v3792_v58 = vpop.f32.mrb[32].mxu1 }
0x1518   : > { %v5874_v59 = vpop.f32.mrb[33].mxu1 }
0x151e   : > { %v5884_v16 = vpop.f32.mrb[34].mxu1 }
0x151f   : > { %v3957_v19 = vadd.f32 %v5884_v16, %v5507_v17  ;;  %v3951_v20 = vpop.f32.mrb[35].mxu1 }
0x1520   : > { %v3952_v28 = vadd.f32 %v5507_v17, %v3951_v20 }
0x1522   : > { %v5990_v29 = vpack.c.bf16 %v3957_v19, %v3952_v28  ;;  %v5528_v19 = vld [vmem:[%s7160_s7 + $0xb] ss:$0 sm:$0xff] }
0x1524   : > { %5992 = vmatpush3.bf16.xpose.msk.msra.mxu1 %vm6750_vm11, %v5990_v29 }
0x1525   : > { %5909 = vmatprep.subr.mxu1 %v6087_v2 }
0x15a4   : > { %v3564_v60 = vpop.xlane.xlu0 %3563 }
0x15a5   : > { %v3565_v61 = vsub.f32 %v3561_v54, %v3564_v60 }
0x15a7   : > { %v3566_v62 = vmul.f32 1.442695, %v3565_v61 }
0x15a9   : > { %6063 = vpow2.f32 %v3566_v62 }
0x15b3   : > { %v6064_v0 = vpop.eup %6063 }
0x15b4   : > { %v3568_v1 = vsel %vm3145_vm12, %v6064_v0, 0.0 }
0x15b5   : > { %3569 = vadd.xlane.f32.xlu1 %v3568_v1  ;;  %v4210_v1 = vld [vmem:[%s7161_s8 + $0x10] sm:$0xff] }
0x1642   : > { %v3570_v12 = vpop.xlane.xlu1 %3569 }
0x1643   : > { %6065 = vrcp.f32 %v3570_v12 }
0x164d   : > { %v6066_v13 = vpop.eup %6065 }
0x164e   : > { %v3572_v14 = vmul.f32 %v6066_v13, %v6064_v0 }
0x1650   : > { %5863 = vmatmul.mubr.msk.f32.vlgmr.msra.gmra.mrb[34].mxu0 %vm3145_vm12, %v3572_v14 }
0x1651   : > { %5866 = vmatpush3.msra.mxu0 %v3649_v15  ;;  %5867 = vmatprep.mubr.msk.f32.mxu0 %vm6088_vm1, %v6087_v2 }
0x1652   : > { %5875 = vmatprep.subr.mxu0 %v6087_v2 }
0x1723   : > { %v3645_v21 = vpop.f32.mrb[34].mxu0 }
0x1724   : > { %v5864_v22 = vpop.f32.mrb[35].mxu0  ;;  %5868 = vmatmul.mubr.msk.f32.vlgmr.msra.gmra.mrb[36].mxu0 %vm935_vm10, %v3645_v21 }
0x1725   : > { %5876 = vmatpush3.xpose.msk.msra.mxu0 %vm703_vm0, %v3796_v30  ;;  %5877 = vmatprep.mubr.msk.f32.mxu0 %vm6088_vm1, %v6087_v2 }
0x1726   : > { %5885 = vmatprep.subr.msk.mxu0 %vm703_vm0, %v3798_v48 }
0x1728   : > { %5878 = vmatmul.mubr.msk.f32.vlgmr.msra.gmra.mrb[38].mxu0 %vm703_vm0, %v6739_v57 }
0x1729   : > { %5887 = vmatprep.mubr.msk.f32.mxu0 %vm703_vm0, %v6685_v5  ;;  %5886 = vmatpush3.xpose.msk.msra.mxu0 %vm703_vm0, %v3798_v48 }
0x172a   : > { %5993 = vmatprep.subr.bf16.mxu0 %v6089_v18 }
0x172c   : > { %5888 = vmatmul.mubr.msk.f32.vlgmr.msra.gmra.mrb[40].mxu0 %vm703_vm0, %v6682_v4 }
0x172d   : > { %5901 = vmatprep.mubr.msk.f32.mxu0 %vm6088_vm1, %v6087_v2 }
0x17f7   : > { %v3719_v32 = vpop.f32.mrb[36].mxu0 }
0x17f8   : > { %v6875_v25 = vadd.f32 %v3792_v58, %v3719_v32  ;;  %v5869_v24 = vpop.f32.mrb[37].mxu0 }
0x17fb   : > { %v3873_v33 = vpop.f32.mrb[38].mxu0 }
0x17fc   : > { %v3874_v45 = vadd.f32 %v5504_v26, %v3873_v33  ;;  %v5879_v46 = vpop.f32.mrb[39].mxu0 }
0x17fe   : > { %5895 = vmatmul.mubr.msk.f32.vlgmr.msra.gmra.mrb[36].mxu1 %vm935_vm10, %v3874_v45 }
0x17ff   : > { %5910 = vmatpush3.xpose.msk.msra.mxu1 %vm703_vm0, %v4285_v47  ;;  %5911 = vmatprep.mubr.msk.f32.mxu1 %vm6088_vm1, %v6087_v2  ;;  %v5889_v54 = vpop.f32.mrb[40].mxu0 }
0x1800   : > { %v4034_v56 = vpop.f32.mrb[41].mxu0  ;;  %v4040_v58 = vadd.f32 %v5889_v54, %v5511_v55  ;;  %5919 = vmatprep.subr.msk.mxu1 %vm703_vm0, %v4287_v8 }
0x1801   : > { %v4035_v59 = vadd.f32 %v5511_v55, %v4034_v56 }
0x1802   : > { %5912 = vmatmul.mubr.msk.f32.vlgmr.msra.gmra.mrb[38].mxu1 %vm703_vm0, %v6739_v57 }
0x1803   : > { %5921 = vmatprep.mubr.msk.f32.mxu1 %vm703_vm0, %v6685_v5  ;;  %v5994_v60 = vpack.c.bf16 %v4040_v58, %v4035_v59  ;;  %5920 = vmatpush3.xpose.msk.msra.mxu1 %vm703_vm0, %v4287_v8 }
0x1804   : > { %5997 = vmatprep.subr.bf16.mxu1 %v6089_v18 }
0x1805   : > { %5996 = vmatpush3.bf16.msk.msra.mxu0 %vm6781_vm15, %v5994_v60 }
0x1806   : > { %5904 = vmatprep.subr.mxu0 %v6087_v2  ;;  %5922 = vmatmul.mubr.msk.f32.vlgmr.msra.gmra.mrb[40].mxu1 %vm703_vm0, %v6682_v4 }
0x1807   : > { %5928 = vmatprep.mubr.msk.f32.mxu1 %vm6088_vm1, %v6087_v2 }
0x18d1   : > { %v4118_v57 = vpop.f32.mrb[36].mxu1 }
0x18d2   : > { %v4122_v31 = vmul.f32 0.35355338, %v4118_v57  ;;  %v5896_v35 = vpop.f32.mrb[37].mxu1  ;;  %v4699_v57 = vld [vmem:[%s7161_s8 + $0x18] sm:$0xff] }
0x18d4   : > { %v4123_v38 = vsel %vm3145_vm12, %v4122_v31, -inf }
0x18d5   : > { %4124 = vmax.xlane.f32.xlu0 %v4123_v38  ;;  %v4362_v39 = vpop.f32.mrb[38].mxu1 }
0x18d6   : > { %v5913_v40 = vpop.f32.mrb[39].mxu1 }
0x18d9   : > { %v5923_v20 = vpop.f32.mrb[40].mxu1 }
0x18da   : > { %v4529_v28 = vadd.f32 %v5923_v20, %v5528_v19  ;;  %v4523_v63 = vpop.f32.mrb[41].mxu1 }
0x18db   : > { %v4524_v29 = vadd.f32 %v5528_v19, %v4523_v63 }
0x18dd   : > { %v6002_v30 = vpack.c.bf16 %v4529_v28, %v4524_v29 }
0x1962   : > { %v4125_v41 = vpop.xlane.xlu0 %4124 }
0x1963   : > { %v4126_v43 = vsub.f32 %v4122_v31, %v4125_v41 }
0x1965   : > { %v4127_v44 = vmul.f32 1.442695, %v4126_v43 }
0x1967   : > { %6067 = vpow2.f32 %v4127_v44 }
0x1971   : > { %v6068_v53 = vpop.eup %6067 }
0x1972   : > { %v4129_v42 = vsel %vm3145_vm12, %v6068_v53, 0.0 }
0x1973   : > { %4130 = vadd.xlane.f32.xlu1 %v4129_v42 }
0x1a00   : > { %v4131_v61 = vpop.xlane.xlu1 %4130 }
0x1a01   : > { %6069 = vrcp.f32 %v4131_v61 }
0x1a0b   : > { %v6070_v62 = vpop.eup %6069 }
0x1a0c   : > { %v4133_v0 = vmul.f32 %v6070_v62, %v6068_v53 }
0x1a0e   : > { %5902 = vmatmul.mubr.msk.f32.vlgmr.msra.gmra.mrb[42].mxu0 %vm3145_vm12, %v4133_v0 }
0x1a0f   : > { %5905 = vmatpush3.msra.mxu0 %v4210_v1  ;;  %5906 = vmatprep.mubr.msk.f32.mxu0 %vm6088_vm1, %v6087_v2 }
0x1a10   : > { %5914 = vmatprep.subr.msk.mxu0 %vm703_vm0, %v4286_v3 }
0x1ae1   : > { %v4206_v6 = vpop.f32.mrb[42].mxu0 }
0x1ae2   : > { %v5903_v7 = vpop.f32.mrb[43].mxu0  ;;  %5907 = vmatmul.mubr.msk.f32.vlgmr.msra.gmra.mrb[44].mxu0 %vm935_vm10, %v4206_v6 }
0x1ae3   : > { %5915 = vmatpush3.xpose.msk.msra.mxu0 %vm703_vm0, %v4286_v3  ;;  %5916 = vmatprep.mubr.msk.f32.mxu0 %vm703_vm0, %v6685_v5 }
0x1ae4   : > { %6005 = vmatprep.subr.bf16.mxu0 %v6089_v18 }
0x1ae6   : > { %5917 = vmatmul.mubr.msk.f32.vlgmr.msra.gmra.mrb[46].mxu0 %vm703_vm0, %v6682_v4  ;;  %v5521_v4 = vld [vmem:[%s7160_s7 + $0x3] ss:$0 sm:$0xff] }
0x1ae7   : > { %5959 = vmatprep.mubr.msk.f32.mxu0 %vm6088_vm1, %v6087_v2  ;;  %v4363_v17 = vadd.f32 %v5521_v4, %v4362_v39  ;;  %v5538_v39 = vld [vmem:[%s7162_s9] ss:$0 sm:$0xff] }
0x1bb5   : > { %v4280_v5 = vpop.f32.mrb[44].mxu0 }
0x1bb6   : > { %v4284_v9 = vadd.f32 %v4280_v5, %v6875_v25  ;;  %v5908_v10 = vpop.f32.mrb[45].mxu0 }
0x1bb9   : > { %v5918_v12 = vpop.f32.mrb[46].mxu0 }
0x1bba   : > { %v4446_v13 = vadd.f32 %v5918_v12, %v5524_v11  ;;  %v4440_v14 = vpop.f32.mrb[47].mxu0 }
0x1bbb   : > { %v4441_v15 = vadd.f32 %v5524_v11, %v4440_v14 }
0x1bbd   : > { %v5998_v16 = vpack.c.bf16 %v4446_v13, %v4441_v15 }
0x1bbf   : > { %6000 = vmatpush3.bf16.xpose.msk.msra.mxu1 %vm6750_vm11, %v5998_v16 }
0x1bc0   : > { %6001 = vmatprep.subr.bf16.mxu1 %v6089_v18 }
0x1bc6   : > { %5929 = vmatmul.mubr.msk.f32.vlgmr.msra.gmra.mrb[42].mxu1 %vm935_vm10, %v4363_v17 }
0x1bc7   : > { %5935 = vmatprep.mubr.msk.f32.mxu1 %vm6088_vm1, %v6087_v2  ;;  %6004 = vmatpush3.bf16.msk.msra.mxu1 %vm6781_vm15, %v6002_v30 }
0x1bc8   : > { %5938 = vmatprep.subr.mxu1 %v6087_v2 }
0x1c99   : > { %v4607_v21 = vpop.f32.mrb[42].mxu1 }
0x1c9a   : > { %v4611_v22 = vmul.f32 0.35355338, %v4607_v21  ;;  %v5930_v32 = vpop.f32.mrb[43].mxu1 }
0x1c9c   : > { %v4612_v25 = vsel %vm3145_vm12, %v4611_v22, -inf }
0x1c9d   : > { %4613 = vmax.xlane.f32.xlu0 %v4612_v25 }
0x1d2a   : > { %v4614_v24 = vpop.xlane.xlu0 %4613 }
0x1d2b   : > { %v4615_v26 = vsub.f32 %v4611_v22, %v4614_v24 }
0x1d2d   : > { %v4616_v33 = vmul.f32 1.442695, %v4615_v26 }
0x1d2f   : > { %6071 = vpow2.f32 %v4616_v33 }
0x1d39   : > { %v6072_v45 = vpop.eup %6071 }
0x1d3a   : > { %v4618_v46 = vsel %vm3145_vm12, %v6072_v45, 0.0 }
0x1d3b   : > { %4619 = vadd.xlane.f32.xlu1 %v4618_v46 }
0x1dc8   : > { %v4620_v47 = vpop.xlane.xlu1 %4619 }
0x1dc9   : > { %6073 = vrcp.f32 %v4620_v47 }
0x1dd3   : > { %v6074_v23 = vpop.eup %6073 }
0x1dd4   : > { %v4622_v48 = vmul.f32 %v6074_v23, %v6072_v45 }
0x1dd6   : > { %5936 = vmatmul.mubr.msk.f32.vlgmr.msra.gmra.mrb[44].mxu1 %vm3145_vm12, %v4622_v48 }
0x1dd7   : > { %5939 = vmatpush3.msra.mxu1 %v4699_v57  ;;  %5940 = vmatprep.mubr.msk.f32.mxu1 %vm6088_vm1, %v6087_v2 }
0x1dd8   : > { %6021 = vmatprep.subr.bf16.mxu1 %v6089_v18 }
0x1ea9   : > { %v4695_v31 = vpop.f32.mrb[44].mxu1 }
0x1eaa   : > { %v5937_v35 = vpop.f32.mrb[45].mxu1  ;;  %5941 = vmatmul.mubr.msk.f32.vlgmr.msra.gmra.mrb[46].mxu1 %vm935_vm10, %v4695_v31  ;;  %vm6023_vm10 = vmpackc.low %vm5093_vm2, %vm5093_vm2 }
0x1eab   : > { %5970 = vmatprep.mubr.msk.f32.mxu1 %vm6088_vm1, %v6087_v2  ;;  %vm7036_vm1 = vmpackc.low %vm703_vm0, %vm703_vm0 }
0x1f7d   : > { %v4769_v38 = vpop.f32.mrb[46].mxu1 }
0x1f7e   : > { %v4773_v40 = vadd.f32 %v4769_v38, %v4284_v9  ;;  %v5942_v41 = vpop.f32.mrb[47].mxu1 }
0x1f80   : > { %v4781_v43 = vadd.f32 %v5538_v39, %v4773_v40 }
0x1f82   : > { %v4785_v44 = vrot.slane %v4781_v43, 1  ;;  %v4786_v53 = vrot.slane %v4781_v43, 2  ;;  %v4787_v42 = vrot.slane %v4781_v43, 3  ;;  %v4788_v54 = vrot.slane %v4781_v43, 4 }
0x1f83   : > { %v4789_v55 = vrot.slane %v4781_v43, 5  ;;  %v4790_v56 = vrot.slane %v4781_v43, 6  ;;  %v4791_v58 = vrot.slane %v4781_v43, 7  ;;  %v4800_v62 = vadd.f32 %v4781_v43, %v6716_v52 }
0x1f84   : > { %v4801_v59 = vadd.f32 %v4785_v44, %v6708_v34  ;;  %v4802_v60 = vadd.f32 %v4786_v53, %v6710_v49  ;;  %v4803_v2 = vadd.f32 %v4787_v42, %v6712_v50  ;;  %v4804_v61 = vadd.f32 %v4788_v54, %v6714_v51 }
0x1f85   : > { %v4805_v0 = vadd.f32 %v4789_v55, %v6718_v27  ;;  %v4806_v6 = vadd.f32 %v4790_v56, %v6722_v36  ;;  %v4807_v7 = vadd.f32 %v4791_v58, %v6724_v37 }
0x1f86   : > { %v4816_v1 = vrot.slane %v4801_v59, 7  ;;  %v4818_v3 = vrot.slane %v4802_v60, 6  ;;  %v4820_v5 = vrot.slane %v4803_v2, 5  ;;  %v4822_v49 = vrot.slane %v4804_v61, 4 }
0x1f87   : > { %v4824_v9 = vrot.slane %v4805_v0, 3  ;;  %v4826_v52 = vrot.slane %v4806_v6, 2  ;;  %v4828_v10 = vrot.slane %v4807_v7, 1 }
0x1f88   : > { %v4817_v8 = vsel %vm683_vm3, %v4816_v1, %v4800_v62 }
0x1f89   : > { %v4819_v34 = vsel %vm686_vm4, %v4818_v3, %v4817_v8  ;;  %v4952_v3 = vld [vmem:[%s7163_s10 + $0x20] sm:$0xff]  ;;  %v4954_v8 = vld [vmem:[%s7163_s10 + $0x30] sm:$0xff] }
0x1f8a   : > { %v4821_v50 = vsel %vm689_vm5, %v4820_v5, %v4819_v34  ;;  %v4955_v5 = vld [vmem:[%s7163_s10 + $0x38] sm:$0xff] }
0x1f8b   : > { %v4823_v51 = vsel %vm692_vm6, %v4822_v49, %v4821_v50  ;;  %v6018_v34 = vpack.c.bf16 %v4955_v5, %v4954_v8  ;;  %v5082_v49 = vld [vmem:[%s7165_s12] sm:$0xff]  ;;  %v5083_v50 = vld [vmem:[%s7165_s12 + $0x8] sm:$0xff] }
0x1f8c   : > { %v4825_v27 = vsel %vm695_vm7, %v4824_v9, %v4823_v51  ;;  %v6022_v9 = vpack.c.bf16 %v5083_v50, %v5082_v49  ;;  %v5084_v51 = vld [vmem:[%s7165_s12 + $0x10] sm:$0xff]  ;;  %v5551_v5 = vld [vmem:[%s7166_s13] ss:$0 sm:$0xff] }
0x1f8d   : > { %v4827_v11 = vsel %vm698_vm8, %v4826_v52, %v4825_v27  ;;  %v5085_v52 = vld [vmem:[%s7165_s12 + $0x18] sm:$0xff] }
0x1f8e   : > { %v4829_v36 = vsel %vm701_vm9, %v4828_v10, %v4827_v11  ;;  %6024 = vmatpush3.bf16.xpose.msk.msra.mxu1 %vm6023_vm10, %v6022_v9  ;;  %v6026_v27 = vpack.c.bf16 %v5085_v52, %v5084_v51 }
0x1f8f   : > { %v4831_v37 = vsel %vm703_vm0, %v4829_v36, 0.0  ;;  %6025 = vmatprep.subr.bf16.mxu1 %v6089_v18 }
0x1f90   : > { %4832 = vadd.xlane.f32.xlu0 %v4831_v37 }
0x1f96   : > { %6028 = vmatpush3.bf16.xpose.msk.msra.mxu1 %vm6023_vm10, %v6026_v27 }
0x201d   : > { %v4833_v12 = vpop.xlane.xlu0 %4832 }
0x201e   : > { %v4834_v13 = vmul.f32 0.03125, %v4833_v12  ;;  %v5539_v12 = vld [vmem:[%s7169_s16] ss:$0 sm:$0xff] }
0x2020   : > { %v4836_v14 = vrot.slane %v4834_v13, 1  ;;  %v4837_v15 = vrot.slane %v4834_v13, 2  ;;  %v4838_v16 = vrot.slane %v4834_v13, 3  ;;  %v4839_v4 = vrot.slane %v4834_v13, 4 }
0x2021   : > { %v4840_v17 = vrot.slane %v4834_v13, 5  ;;  %v4841_v19 = vrot.slane %v4834_v13, 6  ;;  %v4842_v20 = vrot.slane %v4834_v13, 7  ;;  %v6988_v28 = vsub.f32 %v4800_v62, %v4834_v13  ;;  %v4950_v62 = vld [vmem:[%s7163_s10 + $0x10] sm:$0xff] }
0x2022   : > { %v6990_v63 = vsub.f32 %v4801_v59, %v4836_v14  ;;  %v6992_v29 = vsub.f32 %v4802_v60, %v4837_v15  ;;  %v6994_v30 = vsub.f32 %v4803_v2, %v4838_v16  ;;  %v6996_v21 = vsub.f32 %v4804_v61, %v4839_v4  ;;  %v4948_v59 = vld [vmem:[%s7163_s10] sm:$0xff]  ;;  %v4949_v60 = vld [vmem:[%s7163_s10 + $0x8] sm:$0xff] }
0x2023   : > { %v6998_v22 = vsub.f32 %v4805_v0, %v4840_v17  ;;  %v7000_v32 = vsub.f32 %v4806_v6, %v4841_v19  ;;  %v7002_v25 = vsub.f32 %v4807_v7, %v4842_v20  ;;  %v4859_v46 = vmul.f32 %v6988_v28, %v6988_v28  ;;  %v4951_v0 = vld [vmem:[%s7163_s10 + $0x18] sm:$0xff]  ;;  %v4953_v6 = vld [vmem:[%s7163_s10 + $0x28] sm:$0xff] }
0x2024   : > { %v4860_v24 = vmul.f32 %v6990_v63, %v6990_v63  ;;  %v4861_v26 = vmul.f32 %v6992_v29, %v6992_v29  ;;  %v4862_v33 = vmul.f32 %v6994_v30, %v6994_v30  ;;  %v4863_v45 = vmul.f32 %v6996_v21, %v6996_v21 }
0x2025   : > { %v4864_v47 = vmul.f32 %v6998_v22, %v6998_v22  ;;  %v4865_v57 = vmul.f32 %v7000_v32, %v7000_v32  ;;  %v4866_v31 = vmul.f32 %v7002_v25, %v7002_v25  ;;  %v6006_v2 = vpack.c.bf16 %v4949_v60, %v4948_v59 }
0x2026   : > { %v4875_v23 = vrot.slane %v4860_v24, 7  ;;  %v4877_v48 = vrot.slane %v4861_v26, 6  ;;  %v4879_v38 = vrot.slane %v4862_v33, 5  ;;  %v4881_v40 = vrot.slane %v4863_v45, 4 }
0x2027   : > { %v4883_v43 = vrot.slane %v4864_v47, 3  ;;  %v4885_v53 = vrot.slane %v4865_v57, 2  ;;  %v4887_v54 = vrot.slane %v4866_v31, 1  ;;  %6008 = vmatpush3.bf16.xpose.msk.msra.mxu0 %vm7036_vm1, %v6006_v2  ;;  %v6010_v1 = vpack.c.bf16 %v4951_v0, %v4950_v62 }
0x2028   : > { %v4876_v35 = vsel %vm683_vm3, %v4875_v23, %v4859_v46  ;;  %6009 = vmatprep.subr.bf16.mxu0 %v6089_v18  ;;  %v6014_v7 = vpack.c.bf16 %v4953_v6, %v4952_v3 }
0x2029   : > { %v4878_v39 = vsel %vm686_vm4, %v4877_v48, %v4876_v35 }
0x202a   : > { %v4880_v41 = vsel %vm689_vm5, %v4879_v38, %v4878_v39 }
0x202b   : > { %v4882_v44 = vsel %vm692_vm6, %v4881_v40, %v4880_v41 }
0x202c   : > { %v4884_v42 = vsel %vm695_vm7, %v4883_v43, %v4882_v44 }
0x202d   : > { %v4886_v55 = vsel %vm698_vm8, %v4885_v53, %v4884_v42 }
0x202e   : > { %v4888_v56 = vsel %vm701_vm9, %v4887_v54, %v4886_v55 }
0x202f   : > { %v4890_v58 = vsel %vm703_vm0, %v4888_v56, 0.0  ;;  %6012 = vmatpush3.bf16.xpose.msk.msra.mxu0 %vm7036_vm1, %v6010_v1  ;;  %v5541_v1 = vld [vmem:[%s7164_s11] ss:$0 sm:$0xff] }
0x2030   : > { %4891 = vadd.xlane.f32.xlu1 %v4890_v58  ;;  %6013 = vmatprep.subr.bf16.mxu0 %v6089_v18 }
0x2037   : > { %6016 = vmatpush3.bf16.xpose.msk.msra.mxu0 %vm7036_vm1, %v6014_v7 }
0x2038   : > { %6017 = vmatprep.subr.bf16.mxu0 %v6089_v18 }
0x203f   : > { %6020 = vmatpush3.bf16.xpose.msk.msra.mxu0 %vm7036_vm1, %v6018_v34 }
0x20bd   : > { %v4892_v10 = vpop.xlane.xlu1 %4891 }
0x20be   : > { %v4893_v11 = vmul.f32 0.03125, %v4892_v10 }
0x20c0   : > { %v4894_v36 = vadd.f32 1e-05, %v4893_v11 }
0x20c2   : > { %6075 = vrsqrt.f32 %v4894_v36 }
0x20cc   : > { %v6076_v37 = vpop.eup %6075 }
0x20cd   : > { %v4897_v18 = vrot.slane %v6076_v37, 1  ;;  %v4898_v13 = vrot.slane %v6076_v37, 2  ;;  %v4899_v14 = vrot.slane %v6076_v37, 3  ;;  %v4900_v15 = vrot.slane %v6076_v37, 4 }
0x20ce   : > { %v4901_v16 = vrot.slane %v6076_v37, 5  ;;  %v4902_v4 = vrot.slane %v6076_v37, 6  ;;  %v4903_v17 = vrot.slane %v6076_v37, 7  ;;  %v4912_v19 = vmul.f32 %v6076_v37, %v6988_v28  ;;  %v5540_v28 = vld [vmem:[%s7170_s17] ss:$0 sm:$0xff] }
0x20cf   : > { %v4913_v20 = vmul.f32 %v4897_v18, %v6990_v63  ;;  %v4914_v24 = vmul.f32 %v4898_v13, %v6992_v29  ;;  %v4915_v26 = vmul.f32 %v4899_v14, %v6994_v30  ;;  %v4916_v33 = vmul.f32 %v4900_v15, %v6996_v21 }
0x20d0   : > { %v4917_v45 = vmul.f32 %v4901_v16, %v6998_v22  ;;  %v4918_v46 = vmul.f32 %v4902_v4, %v7000_v32  ;;  %v4919_v47 = vmul.f32 %v4903_v17, %v7002_v25  ;;  %v4926_v23 = vmul.f32 %v5539_v12, %v4912_v19 }
0x20d1   : > { %v4927_v48 = vmul.f32 %v5539_v12, %v4913_v20  ;;  %v4928_v57 = vmul.f32 %v5539_v12, %v4914_v24  ;;  %v4929_v31 = vmul.f32 %v5539_v12, %v4915_v26  ;;  %v4930_v35 = vmul.f32 %v5539_v12, %v4916_v33 }
0x20d2   : > { %v4931_v63 = vmul.f32 %v5539_v12, %v4917_v45  ;;  %v4932_v29 = vmul.f32 %v5539_v12, %v4918_v46  ;;  %v4933_v30 = vmul.f32 %v5539_v12, %v4919_v47  ;;  %v4940_v40 = vadd.f32 %v5540_v28, %v4926_v23 }
0x20d3   : > { %v4941_v38 = vadd.f32 %v5540_v28, %v4927_v48  ;;  %v4942_v21 = vadd.f32 %v5540_v28, %v4928_v57  ;;  %v4943_v39 = vadd.f32 %v5540_v28, %v4929_v31  ;;  %v4944_v22 = vadd.f32 %v5540_v28, %v4930_v35 }
0x20d4   : > { %v4945_v32 = vadd.f32 %v5540_v28, %v4931_v63  ;;  %v4946_v43 = vadd.f32 %v5540_v28, %v4932_v29  ;;  %v4947_v44 = vadd.f32 %v5540_v28, %v4933_v30 }
0x20d5   : > { %v4971_v41 = vrot.slane %v4941_v38, 7  ;;  %v4973_v25 = vrot.slane %v4942_v21, 6  ;;  %v4975_v42 = vrot.slane %v4943_v39, 5  ;;  %v4977_v55 = vrot.slane %v4944_v22, 4 }
0x20d6   : > { %v4979_v58 = vrot.slane %v4945_v32, 3  ;;  %v4981_v60 = vrot.slane %v4946_v43, 2  ;;  %v4983_v61 = vrot.slane %v4947_v44, 1 }
0x20d7   : > { %v4972_v53 = vsel %vm683_vm3, %v4971_v41, %v4940_v40 }
0x20d8   : > { %v4974_v54 = vsel %vm686_vm4, %v4973_v25, %v4972_v53 }
0x20d9   : > { %v4976_v56 = vsel %vm689_vm5, %v4975_v42, %v4974_v54 }
0x20da   : > { %v4978_v59 = vsel %vm692_vm6, %v4977_v55, %v4976_v56 }
0x20db   : > { %v4980_v2 = vsel %vm695_vm7, %v4979_v58, %v4978_v59 }
0x20dc   : > { %v4982_v62 = vsel %vm698_vm8, %v4981_v60, %v4980_v2 }
0x20dd   : > { %v4984_v0 = vsel %vm701_vm9, %v4983_v61, %v4982_v62 }
0x20de   : > { %5960 = vmatmul.mubr.msk.f32.vlgmr.msra.gmra.mrb[48].mxu0 %vm703_vm0, %v4984_v0 }
0x21b1   : > { %v5077_v3 = vpop.f32.mrb[48].mxu0 }
0x21b2   : > { %v5078_v6 = vadd.f32 %v5541_v1, %v5077_v3  ;;  %v5961_v7 = vpop.f32.mrb[49].mxu0 }
0x21b4   : > { %v5081_v8 = vmax.f32 %v5078_v6, 0.0 }
0x21b6   : > { %5971 = vmatmul.mubr.msk.f32.vlgmr.msra.gmra.mrb[48].mxu1 %vm5093_vm2, %v5081_v8 }
0x2289   : > { %v5175_v34 = vpop.f32.mrb[48].mxu1 }
0x228a   : > { %v5176_v49 = vadd.f32 %v5551_v5, %v5175_v34  ;;  %v5972_v50 = vpop.f32.mrb[49].mxu1 }
0x228c   : > { %v5182_v9 = vrot.slane %v5176_v49, 1  ;;  %v5183_v51 = vrot.slane %v5176_v49, 2  ;;  %v5184_v52 = vrot.slane %v5176_v49, 3  ;;  %v5185_v27 = vrot.slane %v5176_v49, 4 }
0x228d   : > { %v5186_v10 = vrot.slane %v5176_v49, 5  ;;  %v5187_v11 = vrot.slane %v5176_v49, 6  ;;  %v5188_v36 = vrot.slane %v5176_v49, 7  ;;  %v5197_v14 = vadd.f32 %v5176_v49, %v4940_v40 }
0x228e   : > { %v5198_v37 = vadd.f32 %v5182_v9, %v4941_v38  ;;  %v5199_v12 = vadd.f32 %v5183_v51, %v4942_v21  ;;  %v5200_v18 = vadd.f32 %v5184_v52, %v4943_v39  ;;  %v5201_v13 = vadd.f32 %v5185_v27, %v4944_v22 }
0x228f   : > { %v5202_v15 = vadd.f32 %v5186_v10, %v4945_v32  ;;  %v5203_v17 = vadd.f32 %v5187_v11, %v4946_v43  ;;  %v5204_v19 = vadd.f32 %v5188_v36, %v4947_v44 }
0x2290   : > { %v5213_v16 = vrot.slane %v5198_v37, 7  ;;  %v5215_v4 = vrot.slane %v5199_v12, 6  ;;  %v5217_v24 = vrot.slane %v5200_v18, 5  ;;  %v5219_v33 = vrot.slane %v5201_v13, 4 }
0x2291   : > { %v5221_v46 = vrot.slane %v5202_v15, 3  ;;  %v5223_v23 = vrot.slane %v5203_v17, 2  ;;  %v5225_v57 = vrot.slane %v5204_v19, 1 }
0x2292   : > { %v5214_v20 = vsel %vm683_vm3, %v5213_v16, %v5197_v14 }
0x2293   : > { %v5216_v26 = vsel %vm686_vm4, %v5215_v4, %v5214_v20 }
0x2294   : > { %v5218_v45 = vsel %vm689_vm5, %v5217_v24, %v5216_v26 }
0x2295   : > { %v5220_v47 = vsel %vm692_vm6, %v5219_v33, %v5218_v45 }
0x2296   : > { %v5222_v48 = vsel %vm695_vm7, %v5221_v46, %v5220_v47 }
0x2297   : > { %v5224_v31 = vsel %vm698_vm8, %v5223_v23, %v5222_v48 }
0x2298   : > { %v5226_v35 = vsel %vm701_vm9, %v5225_v57, %v5224_v31 }
0x2299   : > { %v5228_v28 = vsel %vm703_vm0, %v5226_v35, 0.0 }
0x229a   : > { %5229 = vadd.xlane.f32.xlu0 %v5228_v28 }
0x2327   : > { %v5230_v63 = vpop.xlane.xlu0 %5229 }
0x2328   : > { %v5231_v29 = vmul.f32 0.03125, %v5230_v63 }
0x232a   : > { %v5233_v30 = vrot.slane %v5231_v29, 1  ;;  %v5234_v38 = vrot.slane %v5231_v29, 2  ;;  %v5235_v21 = vrot.slane %v5231_v29, 3  ;;  %v5236_v39 = vrot.slane %v5231_v29, 4 }
0x232b   : > { %v5237_v22 = vrot.slane %v5231_v29, 5  ;;  %v5238_v40 = vrot.slane %v5231_v29, 6  ;;  %v5239_v32 = vrot.slane %v5231_v29, 7  ;;  %v5248_v41 = vsub.f32 %v5197_v14, %v5231_v29  ;;  %v5558_v29 = vld [vmem:[%s7172_s19] ss:$0 sm:$0xff] }
0x232c   : > { %v5249_v25 = vsub.f32 %v5198_v37, %v5233_v30  ;;  %v5250_v43 = vsub.f32 %v5199_v12, %v5234_v38  ;;  %v5251_v44 = vsub.f32 %v5200_v18, %v5235_v21  ;;  %v5252_v53 = vsub.f32 %v5201_v13, %v5236_v39  ;;  %v5557_v13 = vld [vmem:[%s7171_s18] ss:$0 sm:$0xff] }
0x232d   : > { %v5253_v42 = vsub.f32 %v5202_v15, %v5237_v22  ;;  %v5254_v54 = vsub.f32 %v5203_v17, %v5238_v40  ;;  %v5255_v55 = vsub.f32 %v5204_v19, %v5239_v32  ;;  %v5256_v2 = vmul.f32 %v5248_v41, %v5248_v41 }
0x232e   : > { %v5257_v56 = vmul.f32 %v5249_v25, %v5249_v25  ;;  %v5258_v58 = vmul.f32 %v5250_v43, %v5250_v43  ;;  %v5259_v59 = vmul.f32 %v5251_v44, %v5251_v44  ;;  %v5260_v60 = vmul.f32 %v5252_v53, %v5252_v53 }
0x232f   : > { %v5261_v61 = vmul.f32 %v5253_v42, %v5253_v42  ;;  %v5262_v1 = vmul.f32 %v5254_v54, %v5254_v54  ;;  %v5263_v3 = vmul.f32 %v5255_v55, %v5255_v55 }
0x2330   : > { %v5272_v62 = vrot.slane %v5257_v56, 7  ;;  %v5274_v0 = vrot.slane %v5258_v58, 6  ;;  %v5276_v7 = vrot.slane %v5259_v59, 5  ;;  %v5278_v5 = vrot.slane %v5260_v60, 4 }
0x2331   : > { %v5280_v49 = vrot.slane %v5261_v61, 3  ;;  %v5282_v9 = vrot.slane %v5262_v1, 2  ;;  %v5284_v52 = vrot.slane %v5263_v3, 1 }
0x2332   : > { %v5273_v6 = vsel %vm683_vm3, %v5272_v62, %v5256_v2 }
0x2333   : > { %v5275_v8 = vsel %vm686_vm4, %v5274_v0, %v5273_v6 }
0x2334   : > { %v5277_v34 = vsel %vm689_vm5, %v5276_v7, %v5275_v8 }
0x2335   : > { %v5279_v50 = vsel %vm692_vm6, %v5278_v5, %v5277_v34 }
0x2336   : > { %v5281_v51 = vsel %vm695_vm7, %v5280_v49, %v5279_v50 }
0x2337   : > { %v5283_v27 = vsel %vm698_vm8, %v5282_v9, %v5281_v51 }
0x2338   : > { %v5285_v10 = vsel %vm701_vm9, %v5284_v52, %v5283_v27 }
0x2339   : > { %v5287_v11 = vsel %vm703_vm0, %v5285_v10, 0.0 }
0x233a   : > { %5288 = vadd.xlane.f32.xlu1 %v5287_v11 }
0x23c7   : > { %v5289_v36 = vpop.xlane.xlu1 %5288 }
0x23c8   : > { %v5290_v37 = vmul.f32 0.03125, %v5289_v36 }
0x23ca   : > { %v5291_v12 = vadd.f32 1e-05, %v5290_v37 }
0x23cc   : > { %6077 = vrsqrt.f32 %v5291_v12 }
0x23d6   : > { %v6078_v18 = vpop.eup %6077 }
0x23d7   : > { %v5294_v14 = vrot.slane %v6078_v18, 1  ;;  %v5295_v15 = vrot.slane %v6078_v18, 2  ;;  %v5296_v16 = vrot.slane %v6078_v18, 3  ;;  %v5297_v4 = vrot.slane %v6078_v18, 4 }
0x23d8   : > { %v5298_v17 = vrot.slane %v6078_v18, 5  ;;  %v5299_v19 = vrot.slane %v6078_v18, 6  ;;  %v5300_v20 = vrot.slane %v6078_v18, 7  ;;  %v5309_v24 = vmul.f32 %v6078_v18, %v5248_v41 }
0x23d9   : > { %v5310_v26 = vmul.f32 %v5294_v14, %v5249_v25  ;;  %v5311_v33 = vmul.f32 %v5295_v15, %v5250_v43  ;;  %v5312_v45 = vmul.f32 %v5296_v16, %v5251_v44  ;;  %v5313_v46 = vmul.f32 %v5297_v4, %v5252_v53 }
0x23da   : > { %v5314_v47 = vmul.f32 %v5298_v17, %v5253_v42  ;;  %v5315_v23 = vmul.f32 %v5299_v19, %v5254_v54  ;;  %v5316_v48 = vmul.f32 %v5300_v20, %v5255_v55  ;;  %v5323_v57 = vmul.f32 %v5557_v13, %v5309_v24 }
0x23db   : > { %v5324_v31 = vmul.f32 %v5557_v13, %v5310_v26  ;;  %v5325_v35 = vmul.f32 %v5557_v13, %v5311_v33  ;;  %v5326_v28 = vmul.f32 %v5557_v13, %v5312_v45  ;;  %v5327_v63 = vmul.f32 %v5557_v13, %v5313_v46 }
0x23dc   : > { %v5328_v30 = vmul.f32 %v5557_v13, %v5314_v47  ;;  %v5329_v38 = vmul.f32 %v5557_v13, %v5315_v23  ;;  %v5330_v21 = vmul.f32 %v5557_v13, %v5316_v48  ;;  %v5337_v41 = vadd.f32 %v5558_v29, %v5323_v57 }
0x23dd   : > { %v5338_v39 = vadd.f32 %v5558_v29, %v5324_v31  ;;  %v5339_v22 = vadd.f32 %v5558_v29, %v5325_v35  ;;  %v5340_v40 = vadd.f32 %v5558_v29, %v5326_v28  ;;  %v5341_v32 = vadd.f32 %v5558_v29, %v5327_v63 }
0x23de   : > { %v5342_v25 = vadd.f32 %v5558_v29, %v5328_v30  ;;  %v5343_v53 = vadd.f32 %v5558_v29, %v5329_v38  ;;  %v5344_v42 = vadd.f32 %v5558_v29, %v5330_v21 }
0x23df   : > { %v5353_v43 = vrot.slane %v5338_v39, 7  ;;  %v5355_v44 = vrot.slane %v5339_v22, 6  ;;  %v5357_v55 = vrot.slane %v5340_v40, 5  ;;  %v5359_v58 = vrot.slane %v5341_v32, 4 }
0x23e0   : > { %v5361_v60 = vrot.slane %v5342_v25, 3  ;;  %v5363_v61 = vrot.slane %v5343_v53, 2  ;;  %v5365_v0 = vrot.slane %v5344_v42, 1 }
0x23e1   : > { %v5354_v54 = vsel %vm683_vm3, %v5353_v43, %v5337_v41 }
0x23e2   : > { %v5356_v56 = vsel %vm686_vm4, %v5355_v44, %v5354_v54 }
0x23e3   : > { %v5358_v59 = vsel %vm689_vm5, %v5357_v55, %v5356_v56 }
0x23e4   : > { %v5360_v2 = vsel %vm692_vm6, %v5359_v58, %v5358_v59 }
0x23e5   : > { %v5362_v62 = vsel %vm695_vm7, %v5361_v60, %v5360_v2 }
0x23e6   : > { %v5364_v1 = vsel %vm698_vm8, %v5363_v61, %v5362_v62 }
0x23e7   : > { %v5366_v3 = vsel %vm701_vm9, %v5365_v0, %v5364_v1 }
0x23e8   : > { %5368 = vst.msk [vmem:[%s607_s21] sm:$0xff] %vm703_vm0, %v5366_v3 }
0x23e9 PF: > { %s7205_s22 = sld [smem:[#allocation2_spill]] }
0x23ef   : > { %s30_s1 = sadd.s32 1, %s7205_s22  }
0x23f0   : > { %p27_p5 = scmp.ge.s32.totalorder %s30_s1, 4  }
0x23f2   :  { %29 = sbr.rel (!%p27_p5) target bundleno = 8 (0x8), region = 127 }

</bundles_post_ra>
